<compile_context>
chip_gen: v5e
topology: v5e:2x2
jax: 0.10.0
libtpu: 0.0.40
codegen_flags: <defaults>
</compile_context>

<pallas_src>
from functools import partial

import jax
import jax.numpy as jnp
from jax import lax
from jax.experimental import pallas as pl
from jax.experimental.pallas import tpu as pltpu

# Safely below v7x physical VMEM (64 MiB), above default scoped limits on all gens.
_VMEM_LIMIT = 48 * 1024 * 1024


def _pick_tile(dim, target, align):
    """Largest multiple of `align` dividing `dim` and <= target; `dim` if dim <= target.

    Never returns a tile that is neither `align`-aligned nor the full dim, so
    block shapes always satisfy the (8, 128) layout rule.
    """
    if dim <= target:
        return dim
    t = (target // align) * align
    while t >= align:
        if dim % t == 0:
            return t
        t -= align
    # No aligned divisor <= target: fall back to one full-dim block.
    # TODO(synk): pad awkward dims instead of falling back to a single large block.
    return dim


def _compiler_params(dims):
    return pltpu.CompilerParams(dimension_semantics=dims,
                                vmem_limit_bytes=_VMEM_LIMIT)


# ----------------------------------------------------------------------------
# Kernel 1: tiled matmul + bias (Q projection, fused KV projection)
# ----------------------------------------------------------------------------
def _linear_kernel(x_ref, w_ref, b_ref, o_ref, acc_ref):
    k = pl.program_id(2)

    @pl.when(k == 0)
    def _():
        acc_ref[...] = jnp.zeros_like(acc_ref)

    # Weights are already bf16 (pre-cast on host); x cast is a no-op when x is bf16.
    acc_ref[...] += jnp.dot(x_ref[...].astype(jnp.bfloat16), w_ref[...],
                            preferred_element_type=jnp.float32)

    @pl.when(k == pl.num_programs(2) - 1)
    def _():
        o_ref[...] = (acc_ref[...] + b_ref[...]).astype(o_ref.dtype)


def linear(x, w, b, out_dtype=None, tm=256, tn=1024, tk=1024):
    """x: (N, K), w: (K, M) bf16 (pre-transposed vs torch), b: (M,) f32."""
    N, K = x.shape
    Kw, M = w.shape
    assert K == Kw
    assert w.dtype == jnp.bfloat16, "pre-cast weights with prepare_params()"
    out_dtype = out_dtype or x.dtype
    tm = _pick_tile(N, tm, 8)
    tn = _pick_tile(M, tn, 128)
    tk = _pick_tile(K, tk, 128)
    grid = (N // tm, M // tn, K // tk)
    return pl.pallas_call(
        _linear_kernel,
        out_shape=jax.ShapeDtypeStruct((N, M), out_dtype),
        grid=grid,
        in_specs=[
            pl.BlockSpec((tm, tk), lambda i, j, k: (i, k)),
            pl.BlockSpec((tk, tn), lambda i, j, k: (k, j)),
            pl.BlockSpec((1, tn), lambda i, j, k: (0, j)),
        ],
        out_specs=pl.BlockSpec((tm, tn), lambda i, j, k: (i, j)),
        scratch_shapes=[pltpu.VMEM((tm, tn), jnp.float32)],
        compiler_params=_compiler_params(("parallel", "parallel", "arbitrary")),
    )(x, w, b.reshape(1, M))


# ----------------------------------------------------------------------------
# Kernel 2: multi-head attention core. Grid over (batch, query-length tiles);
# all heads handled in-kernel (static loop, one head live at a time, outputs
# written straight into the (tl, E) output block — no trailing concat).
# Inputs/outputs use the free (T, B*E) view so no XLA transposes materialize.
# ----------------------------------------------------------------------------
def _attn_kernel(q_ref, kv_ref, o_ref, *, nhead, head_dim, e_dim):
    q = q_ref[...]                       # (tl, E) bf16; scale folded into Wq
    kv = kv_ref[...]                     # (S, 2E) bf16
    k = kv[:, :e_dim]
    v = kv[:, e_dim:]
    # TODO(synk): per-head slices are hd (<128) lanes wide -> lane relayouts;
    # a head-major projection layout would remove them but needs host transposes.
    for h in range(nhead):               # static loop; only one head live at a time
        sl = slice(h * head_dim, (h + 1) * head_dim)
        # Contract head_dim of q with head_dim of k directly (no explicit .T).
        s = lax.dot_general(q[:, sl], k[:, sl], (((1,), (1,)), ((), ())),
                            preferred_element_type=jnp.float32)       # (tl, S)
        m = jnp.max(s, axis=-1, keepdims=True)
        # TODO(synk): on v6e/v7x compute exp in bf16 (2x EUP rate); keep f32 for v5e.
        p = jnp.exp(s - m)
        denom = jnp.sum(p, axis=-1, keepdims=True)
        p = p * pl.reciprocal(denom, approx=True)        # EUP slot, frees VALU
        o_ref[:, sl] = jnp.dot(p.astype(v.dtype), v[:, sl],
                               preferred_element_type=jnp.float32
                               ).astype(o_ref.dtype)                   # (tl, hd)


def sdpa(q_lbe, kv_sb2e, batch, e_dim, nhead, tl=256):
    """q: (L, B*E), kv: (S, B*2E) -> (L, B*E)."""
    L = q_lbe.shape[0]
    S = kv_sb2e.shape[0]
    head_dim = e_dim // nhead
    tl = _pick_tile(L, tl, 8)
    # TODO(synk): for long S (esp. on v7x), tile S with flash-style online-softmax
    # accumulators in VMEM scratch instead of one (S, 2E) block per step.
    return pl.pallas_call(
        partial(_attn_kernel, nhead=nhead, head_dim=head_dim, e_dim=e_dim),
        out_shape=jax.ShapeDtypeStruct((L, batch * e_dim), q_lbe.dtype),
        grid=(batch, L // tl),
        in_specs=[
            pl.BlockSpec((tl, e_dim), lambda b, i: (i, b)),
            pl.BlockSpec((S, 2 * e_dim), lambda b, i: (0, b)),
        ],
        out_specs=pl.BlockSpec((tl, e_dim), lambda b, i: (i, b)),
        compiler_params=_compiler_params(("parallel", "parallel")),
    )(q_lbe, kv_sb2e)


# ----------------------------------------------------------------------------
# Kernel 3: out_proj matmul + bias + residual add + LayerNorm, fused.
# Grid (row tiles, K tiles); LN epilogue on the last K step. Emits bf16 so the
# FFN kernel reads a bf16 resident x tile.
# ----------------------------------------------------------------------------
def _matmul_ln_kernel(x_ref, w_ref, b_ref, res_ref, g_ref, beta_ref, o_ref,
                      acc_ref, *, eps):
    k = pl.program_id(1)

    @pl.when(k == 0)
    def _():
        acc_ref[...] = jnp.zeros_like(acc_ref)

    acc_ref[...] += jnp.dot(x_ref[...].astype(jnp.bfloat16), w_ref[...],
                            preferred_element_type=jnp.float32)

    @pl.when(k == pl.num_programs(1) - 1)
    def _():
        y = acc_ref[...] + b_ref[...] + res_ref[...].astype(jnp.float32)
        mean = jnp.mean(y, axis=-1, keepdims=True)
        var = jnp.mean((y - mean) ** 2, axis=-1, keepdims=True)
        yn = (y - mean) * lax.rsqrt(var + eps)
        o_ref[...] = (yn * g_ref[...] + beta_ref[...]).astype(o_ref.dtype)


def matmul_bias_residual_layernorm(x, w, b, res, gamma, beta, eps=1e-5,
                                   out_dtype=jnp.bfloat16, tm=256, tk=1024):
    N, K = x.shape
    Kw, M = w.shape
    assert K == Kw and res.shape == (N, M)
    assert w.dtype == jnp.bfloat16, "pre-cast weights with prepare_params()"
    tm = _pick_tile(N, tm, 8)
    tk = _pick_tile(K, tk, 128)
    grid = (N // tm, K // tk)
    # TODO(synk): for d_model >= 2048 on v7x, also tile the M/output dimension.
    return pl.pallas_call(
        partial(_matmul_ln_kernel, eps=eps),
        out_shape=jax.ShapeDtypeStruct((N, M), out_dtype),
        grid=grid,
        in_specs=[
            pl.BlockSpec((tm, tk), lambda i, k: (i, k)),
            pl.BlockSpec((tk, M), lambda i, k: (k, 0)),
            pl.BlockSpec((1, M), lambda i, k: (0, 0)),
            pl.BlockSpec((tm, M), lambda i, k: (i, 0)),
            pl.BlockSpec((1, M), lambda i, k: (0, 0)),
            pl.BlockSpec((1, M), lambda i, k: (0, 0)),
        ],
        out_specs=pl.BlockSpec((tm, M), lambda i, k: (i, 0)),
        scratch_shapes=[pltpu.VMEM((tm, M), jnp.float32)],
        compiler_params=_compiler_params(("parallel", "arbitrary")),
    )(x, w, b.reshape(1, M), res, gamma.reshape(1, M), beta.reshape(1, M))


# ----------------------------------------------------------------------------
# Kernel 4: whole FFN (linear1 + ReLU + linear2) + residual + LayerNorm, fused.
# Grid (row tiles, d_ff tiles); the (tm, tf) intermediate stays in VMEM/vregs.
# x tile is bf16 and resident across the f axis; residual cast to f32 only in
# the LN2 epilogue.
# ----------------------------------------------------------------------------
def _ffn_ln_kernel(x_ref, w1_ref, b1_ref, w2_ref, b2_ref, g_ref, beta_ref,
                   o_ref, acc_ref, *, eps):
    f = pl.program_id(1)

    @pl.when(f == 0)
    def _():
        acc_ref[...] = jnp.zeros_like(acc_ref)

    x = x_ref[...]                                       # bf16, resident across f
    h = jnp.dot(x.astype(jnp.bfloat16), w1_ref[...],
                preferred_element_type=jnp.float32)
    h = jnp.maximum(h + b1_ref[...], 0.0)
    acc_ref[...] += jnp.dot(h.astype(jnp.bfloat16), w2_ref[...],
                            preferred_element_type=jnp.float32)

    @pl.when(f == pl.num_programs(1) - 1)
    def _():
        y = acc_ref[...] + b2_ref[...] + x.astype(jnp.float32)   # residual = FFN input
        mean = jnp.mean(y, axis=-1, keepdims=True)
        var = jnp.mean((y - mean) ** 2, axis=-1, keepdims=True)
        yn = (y - mean) * lax.rsqrt(var + eps)
        o_ref[...] = (yn * g_ref[...] + beta_ref[...]).astype(o_ref.dtype)


def ffn_residual_layernorm(x, w1, b1, w2, b2, gamma, beta, eps=1e-5,
                           out_dtype=jnp.float32, tm=256, tf=1024):
    N, E = x.shape
    E1, F = w1.shape
    assert E1 == E and w2.shape == (F, E)
    assert w1.dtype == jnp.bfloat16 and w2.dtype == jnp.bfloat16
    tm = _pick_tile(N, tm, 8)
    tf = _pick_tile(F, tf, 128)
    grid = (N // tm, F // tf)
    return pl.pallas_call(
        partial(_ffn_ln_kernel, eps=eps),
        out_shape=jax.ShapeDtypeStruct((N, E), out_dtype),
        grid=grid,
        in_specs=[
            pl.BlockSpec((tm, E), lambda i, f: (i, 0)),   # resident across f (bf16)
            pl.BlockSpec((E, tf), lambda i, f: (0, f)),
            pl.BlockSpec((1, tf), lambda i, f: (0, f)),
            pl.BlockSpec((tf, E), lambda i, f: (f, 0)),
            pl.BlockSpec((1, E), lambda i, f: (0, 0)),
            pl.BlockSpec((1, E), lambda i, f: (0, 0)),
            pl.BlockSpec((1, E), lambda i, f: (0, 0)),
        ],
        out_specs=pl.BlockSpec((tm, E), lambda i, f: (i, 0)),
        scratch_shapes=[pltpu.VMEM((tm, E), jnp.float32)],
        compiler_params=_compiler_params(("parallel", "arbitrary")),
    )(x, w1, b1.reshape(1, F), w2, b2.reshape(1, E),
      gamma.reshape(1, E), beta.reshape(1, E))


# ----------------------------------------------------------------------------
# Host-side one-time weight prep: fold softmax scale into Wq, cast weights bf16.
# ----------------------------------------------------------------------------
def prepare_params(params, nhead):
    d_model = params["wq"].shape[0]
    scale = 1.0 / ((d_model // nhead) ** 0.5)
    bf = jnp.bfloat16
    return {
        "wq": (params["wq"] * scale).astype(bf),
        "bq": params["bq"] * scale,
        "wkv": params["wkv"].astype(bf), "bkv": params["bkv"],
        "wo": params["wo"].astype(bf), "bo": params["bo"],
        "g1": params["g1"], "b1": params["b1"],
        "g2": params["g2"], "b2": params["b2"],
        "w_ff1": params["w_ff1"].astype(bf), "b_ff1": params["b_ff1"],
        "w_ff2": params["w_ff2"].astype(bf), "b_ff2": params["b_ff2"],
    }


# ----------------------------------------------------------------------------
# Full TransformerDecoderLayer forward (matches the module: one cross-attention
# sublayer tgt->memory, then FFN, with two LayerNorms).
# ----------------------------------------------------------------------------
def transformer_decoder_layer(tgt, memory, prepared, nhead):
    """tgt: (L, B, E), memory: (S, B, E) -> (L, B, E). Dropouts = identity (eval)."""
    L, B, E = tgt.shape
    S = memory.shape[0]
    assert E % nhead == 0
    # Attention layout needs per-batch E columns to be lane aligned.
    # TODO(synk): support d_model not a multiple of 128 (needs a padded path).
    assert E % 128 == 0, "d_model must be a multiple of 128 for this attention layout"

    tgt2d = tgt.reshape(L * B, E)       # free row-major view
    mem2d = memory.reshape(S * B, E)

    # Projections emitted in bf16 to halve HBM traffic into the attention kernel.
    q = linear(tgt2d, prepared["wq"], prepared["bq"], out_dtype=jnp.bfloat16)
    kv = linear(mem2d, prepared["wkv"], prepared["bkv"], out_dtype=jnp.bfloat16)

    # (T*B, C) -> (T, B*C) is a free reshape (same memory layout): no transposes.
    attn = sdpa(q.reshape(L, B * E), kv.reshape(S, B * 2 * E), B, E, nhead)
    attn2d = attn.reshape(L * B, E)                                      # free

    # tgt = norm1(tgt + dropout1(out_proj(attn)))  — fused; LN1 output in bf16.
    x = matmul_bias_residual_layernorm(attn2d, prepared["wo"], prepared["bo"],
                                       tgt2d, prepared["g1"], prepared["b1"],
                                       out_dtype=jnp.bfloat16)

    # tgt = norm2(x + dropout2(linear2(dropout(relu(linear1(x))))))  — fully fused.
    out = ffn_residual_layernorm(x, prepared["w_ff1"], prepared["b_ff1"],
                                 prepared["w_ff2"], prepared["b_ff2"],
                                 prepared["g2"], prepared["b2"],
                                 out_dtype=jnp.float32)

    return out.reshape(L, B, E)


def init_params(key, d_model, d_ff=2048, dtype=jnp.float32):
    keys = jax.random.split(key, 5)
    s = 0.02

    def w(k, shape):
        return jax.random.normal(k, shape, dtype) * s

    return {
        # Projections stored pre-transposed as (in, out); K and V fused into one matmul.
        "wq": w(keys[0], (d_model, d_model)),
        "bq": jnp.zeros((d_model,), dtype),
        "wkv": w(keys[1], (d_model, 2 * d_model)),
        "bkv": jnp.zeros((2 * d_model,), dtype),
        "wo": w(keys[2], (d_model, d_model)),
        "bo": jnp.zeros((d_model,), dtype),
        "g1": jnp.ones((d_model,), dtype), "b1": jnp.zeros((d_model,), dtype),
        "g2": jnp.ones((d_model,), dtype), "b2": jnp.zeros((d_model,), dtype),
        "w_ff1": w(keys[3], (d_model, d_ff)), "b_ff1": jnp.zeros((d_ff,), dtype),
        "w_ff2": w(keys[4], (d_ff, d_model)), "b_ff2": jnp.zeros((d_model,), dtype),
    }


# ----------------------------------------------------------------------------
# Pure-JAX f32 reference for a sanity check.
# ----------------------------------------------------------------------------
def _layernorm_ref(x, g, b, eps=1e-5):
    mean = jnp.mean(x, axis=-1, keepdims=True)
    var = jnp.mean((x - mean) ** 2, axis=-1, keepdims=True)
    return (x - mean) * lax.rsqrt(var + eps) * g + b


def reference(tgt, memory, params, nhead):
    L, B, E = tgt.shape
    S = memory.shape[0]
    hd = E // nhead
    scale = 1.0 / (hd ** 0.5)
    q = tgt.reshape(L * B, E) @ params["wq"] + params["bq"]
    kv = memory.reshape(S * B, E) @ params["wkv"] + params["bkv"]
    k, v = kv[:, :E], kv[:, E:]
    qh = q.reshape(L, B, nhead, hd).transpose(1, 2, 0, 3)
    kh = k.reshape(S, B, nhead, hd).transpose(1, 2, 0, 3)
    vh = v.reshape(S, B, nhead, hd).transpose(1, 2, 0, 3)
    s = jnp.einsum("bhld,bhsd->bhls", qh, kh) * scale
    p = jax.nn.softmax(s, axis=-1)
    o = jnp.einsum("bhls,bhsd->bhld", p, vh)
    attn = o.transpose(2, 0, 1, 3).reshape(L * B, E) @ params["wo"] + params["bo"]
    x = _layernorm_ref(tgt.reshape(L * B, E) + attn, params["g1"], params["b1"])
    h = jnp.maximum(x @ params["w_ff1"] + params["b_ff1"], 0.0)
    ff = h @ params["w_ff2"] + params["b_ff2"]
    out = _layernorm_ref(x + ff, params["g2"], params["b2"])
    return out.reshape(L, B, E)


if __name__ == "__main__":
    # Small, module-consistent shapes, seq-first (L, B, d_model); d_ff fixed at 2048.
    L, S, B = 8, 16, 2
    d_model, nhead = 128, 4

    key = jax.random.PRNGKey(0)
    k_tgt, k_mem, k_par = jax.random.split(key, 3)
    tgt = jax.random.normal(k_tgt, (L, B, d_model), jnp.float32)
    memory = jax.random.normal(k_mem, (S, B, d_model), jnp.float32)
    params = init_params(k_par, d_model)
    prepared = jax.tree_util.tree_map(jax.block_until_ready,
                                      prepare_params(params, nhead))

    fwd = jax.jit(transformer_decoder_layer, static_argnums=3)
    out = jax.block_until_ready(fwd(tgt, memory, prepared, nhead))

    assert out.shape == (L, B, d_model)
    assert bool(jnp.all(jnp.isfinite(out)))

    ref = reference(tgt, memory, params, nhead)
    max_err = float(jnp.max(jnp.abs(out - ref)))
    assert max_err < 5e-2, f"mismatch vs f32 reference: max_err={max_err}"

    print("KERNEL_OK")
</pallas_src>

<mosaic_0001>
module attributes {stable_mosaic.version = 11 : i64} {
  func.func @_linear_kernel(%arg0: i32, %arg1: i32, %arg2: i32, %arg3: memref<32x128xf32, #tpu.memory_space<vmem>>, %arg4: memref<128x256xbf16, #tpu.memory_space<vmem>>, %arg5: memref<1x256xf32, #tpu.memory_space<vmem>>, %arg6: memref<32x256xbf16, #tpu.memory_space<vmem>>, %arg7: memref<32x256xf32, #tpu.memory_space<vmem>>) attributes {dimension_semantics = [#tpu.dimension_semantics<parallel>, #tpu.dimension_semantics<parallel>, #tpu.dimension_semantics<arbitrary>], iteration_bounds = array<i64: 1, 1, 1>, scalar_prefetch = 0 : i64, scratch_operands = 1 : i64, tpu.core_type = #tpu.core_type<tc>, window_params = [{transform_indices = @transform_0, window_bounds = array<i64: 32, 128>}, {transform_indices = @transform_1, window_bounds = array<i64: 128, 256>}, {transform_indices = @transform_2, window_bounds = array<i64: 1, 256>}, {transform_indices = @transform_3, window_bounds = array<i64: 32, 256>}]} {
    %c0_i32 = arith.constant 0 : i32
    %0 = arith.cmpi eq, %arg2, %c0_i32 : i32
    %1 = arith.extui %0 : i1 to i32
    %c0_i32_0 = arith.constant 0 : i32
    %2 = arith.cmpi ne, %1, %c0_i32_0 : i32
    scf.if %2 {
      %cst_10 = arith.constant 0.000000e+00 : f32
      %13 = vector.broadcast %cst_10 : f32 to vector<32x256xf32>
      %c0_11 = arith.constant 0 : index
      %c0_12 = arith.constant 0 : index
      %14 = vector.load %arg7[%c0_11, %c0_12] : memref<32x256xf32, #tpu.memory_space<vmem>>, vector<32x256xf32>
      tpu.vector_store %arg7[%c0_11, %c0_12], %13 {strides = array<i32>} : memref<32x256xf32, #tpu.memory_space<vmem>>, vector<32x256xf32>,
    } else {
    }
    %c0 = arith.constant 0 : index
    %c0_1 = arith.constant 0 : index
    %3 = vector.load %arg7[%c0, %c0_1] : memref<32x256xf32, #tpu.memory_space<vmem>>, vector<32x256xf32>
    %c0_2 = arith.constant 0 : index
    %c0_3 = arith.constant 0 : index
    %4 = vector.load %arg3[%c0_2, %c0_3] : memref<32x128xf32, #tpu.memory_space<vmem>>, vector<32x128xf32>
    %5 = arith.truncf %4 : vector<32x128xf32> to vector<32x128xbf16>
    %c0_4 = arith.constant 0 : index
    %c0_5 = arith.constant 0 : index
    %6 = vector.load %arg4[%c0_4, %c0_5] : memref<128x256xbf16, #tpu.memory_space<vmem>>, vector<128x256xbf16>
    %cst = arith.constant dense<0.000000e+00> : vector<32x256xf32>
    %7 = tpu.matmul %5, %6, %cst {dimension_numbers = #tpu.dot_dimension_numbers<[1], [0], [0], [1], [0, 0, 1, 1], [], []>} : vector<32x128xbf16>, vector<128x256xbf16>, vector<32x256xf32> -> vector<32x256xf32>
    %8 = arith.addf %3, %7 : vector<32x256xf32>
    %c0_6 = arith.constant 0 : index
    %c0_7 = arith.constant 0 : index
    %9 = vector.load %arg7[%c0_6, %c0_7] : memref<32x256xf32, #tpu.memory_space<vmem>>, vector<32x256xf32>
    tpu.vector_store %arg7[%c0_6, %c0_7], %8 {strides = array<i32>} : memref<32x256xf32, #tpu.memory_space<vmem>>, vector<32x256xf32>,
    %c0_i32_8 = arith.constant 0 : i32
    %10 = arith.cmpi eq, %arg2, %c0_i32_8 : i32
    %11 = arith.extui %10 : i1 to i32
    %c0_i32_9 = arith.constant 0 : i32
    %12 = arith.cmpi ne, %11, %c0_i32_9 : i32
    scf.if %12 {
      %c0_10 = arith.constant 0 : index
      %c0_11 = arith.constant 0 : index
      %13 = vector.load %arg7[%c0_10, %c0_11] : memref<32x256xf32, #tpu.memory_space<vmem>>, vector<32x256xf32>
      %c0_12 = arith.constant 0 : index
      %c0_13 = arith.constant 0 : index
      %14 = vector.load %arg5[%c0_12, %c0_13] : memref<1x256xf32, #tpu.memory_space<vmem>>, vector<1x256xf32>
      %15 = vector.broadcast %14 : vector<1x256xf32> to vector<32x256xf32>
      %16 = arith.addf %13, %15 : vector<32x256xf32>
      %17 = arith.truncf %16 : vector<32x256xf32> to vector<32x256xbf16>
      %c0_14 = arith.constant 0 : index
      %c0_15 = arith.constant 0 : index
      %18 = vector.load %arg6[%c0_14, %c0_15] : memref<32x256xbf16, #tpu.memory_space<vmem>>, vector<32x256xbf16>
      tpu.vector_store %arg6[%c0_14, %c0_15], %17 {strides = array<i32>} : memref<32x256xbf16, #tpu.memory_space<vmem>>, vector<32x256xbf16>,
    } else {
    }
    return
  }
  func.func @transform_0(%arg0: i32, %arg1: i32, %arg2: i32) -> (i32, i32) {
    %c0_i32 = arith.constant 0 : i32
    return %arg0, %arg2 : i32, i32
  }
  func.func @transform_1(%arg0: i32, %arg1: i32, %arg2: i32) -> (i32, i32) {
    %c0_i32 = arith.constant 0 : i32
    return %arg2, %arg1 : i32, i32
  }
  func.func @transform_2(%arg0: i32, %arg1: i32, %arg2: i32) -> (i32, i32) {
    %c0_i32 = arith.constant 0 : i32
    %c0_i32_0 = arith.constant 0 : i32
    return %c0_i32, %arg1 : i32, i32
  }
  func.func @transform_3(%arg0: i32, %arg1: i32, %arg2: i32) -> (i32, i32) {
    %c0_i32 = arith.constant 0 : i32
    return %arg0, %arg1 : i32, i32
  }
}

module attributes {stable_mosaic.version = 11 : i64} {
  func.func @_linear_kernel(%arg0: i32, %arg1: i32, %arg2: i32, %arg3: memref<16x128xf32, #tpu.memory_space<vmem>>, %arg4: memref<128x128xbf16, #tpu.memory_space<vmem>>, %arg5: memref<1x128xf32, #tpu.memory_space<vmem>>, %arg6: memref<16x128xbf16, #tpu.memory_space<vmem>>, %arg7: memref<16x128xf32, #tpu.memory_space<vmem>>) attributes {dimension_semantics = [#tpu.dimension_semantics<parallel>, #tpu.dimension_semantics<parallel>, #tpu.dimension_semantics<arbitrary>], iteration_bounds = array<i64: 1, 1, 1>, scalar_prefetch = 0 : i64, scratch_operands = 1 : i64, tpu.core_type = #tpu.core_type<tc>, window_params = [{transform_indices = @transform_0, window_bounds = array<i64: 16, 128>}, {transform_indices = @transform_1, window_bounds = array<i64: 128, 128>}, {transform_indices = @transform_2, window_bounds = array<i64: 1, 128>}, {transform_indices = @transform_3, window_bounds = array<i64: 16, 128>}]} {
    %c0_i32 = arith.constant 0 : i32
    %0 = arith.cmpi eq, %arg2, %c0_i32 : i32
    %1 = arith.extui %0 : i1 to i32
    %c0_i32_0 = arith.constant 0 : i32
    %2 = arith.cmpi ne, %1, %c0_i32_0 : i32
    scf.if %2 {
      %cst_10 = arith.constant 0.000000e+00 : f32
      %13 = vector.broadcast %cst_10 : f32 to vector<16x128xf32>
      %c0_11 = arith.constant 0 : index
      %c0_12 = arith.constant 0 : index
      %14 = vector.load %arg7[%c0_11, %c0_12] : memref<16x128xf32, #tpu.memory_space<vmem>>, vector<16x128xf32>
      tpu.vector_store %arg7[%c0_11, %c0_12], %13 {strides = array<i32>} : memref<16x128xf32, #tpu.memory_space<vmem>>, vector<16x128xf32>,
    } else {
    }
    %c0 = arith.constant 0 : index
    %c0_1 = arith.constant 0 : index
    %3 = vector.load %arg7[%c0, %c0_1] : memref<16x128xf32, #tpu.memory_space<vmem>>, vector<16x128xf32>
    %c0_2 = arith.constant 0 : index
    %c0_3 = arith.constant 0 : index
    %4 = vector.load %arg3[%c0_2, %c0_3] : memref<16x128xf32, #tpu.memory_space<vmem>>, vector<16x128xf32>
    %5 = arith.truncf %4 : vector<16x128xf32> to vector<16x128xbf16>
    %c0_4 = arith.constant 0 : index
    %c0_5 = arith.constant 0 : index
    %6 = vector.load %arg4[%c0_4, %c0_5] : memref<128x128xbf16, #tpu.memory_space<vmem>>, vector<128x128xbf16>
    %cst = arith.constant dense<0.000000e+00> : vector<16x128xf32>
    %7 = tpu.matmul %5, %6, %cst {dimension_numbers = #tpu.dot_dimension_numbers<[1], [0], [0], [1], [0, 0, 1, 1], [], []>} : vector<16x128xbf16>, vector<128x128xbf16>, vector<16x128xf32> -> vector<16x128xf32>
    %8 = arith.addf %3, %7 : vector<16x128xf32>
    %c0_6 = arith.constant 0 : index
    %c0_7 = arith.constant 0 : index
    %9 = vector.load %arg7[%c0_6, %c0_7] : memref<16x128xf32, #tpu.memory_space<vmem>>, vector<16x128xf32>
    tpu.vector_store %arg7[%c0_6, %c0_7], %8 {strides = array<i32>} : memref<16x128xf32, #tpu.memory_space<vmem>>, vector<16x128xf32>,
    %c0_i32_8 = arith.constant 0 : i32
    %10 = arith.cmpi eq, %arg2, %c0_i32_8 : i32
    %11 = arith.extui %10 : i1 to i32
    %c0_i32_9 = arith.constant 0 : i32
    %12 = arith.cmpi ne, %11, %c0_i32_9 : i32
    scf.if %12 {
      %c0_10 = arith.constant 0 : index
      %c0_11 = arith.constant 0 : index
      %13 = vector.load %arg7[%c0_10, %c0_11] : memref<16x128xf32, #tpu.memory_space<vmem>>, vector<16x128xf32>
      %c0_12 = arith.constant 0 : index
      %c0_13 = arith.constant 0 : index
      %14 = vector.load %arg5[%c0_12, %c0_13] : memref<1x128xf32, #tpu.memory_space<vmem>>, vector<1x128xf32>
      %15 = vector.broadcast %14 : vector<1x128xf32> to vector<16x128xf32>
      %16 = arith.addf %13, %15 : vector<16x128xf32>
      %17 = arith.truncf %16 : vector<16x128xf32> to vector<16x128xbf16>
      %c0_14 = arith.constant 0 : index
      %c0_15 = arith.constant 0 : index
      %18 = vector.load %arg6[%c0_14, %c0_15] : memref<16x128xbf16, #tpu.memory_space<vmem>>, vector<16x128xbf16>
      tpu.vector_store %arg6[%c0_14, %c0_15], %17 {strides = array<i32>} : memref<16x128xbf16, #tpu.memory_space<vmem>>, vector<16x128xbf16>,
    } else {
    }
    return
  }
  func.func @transform_0(%arg0: i32, %arg1: i32, %arg2: i32) -> (i32, i32) {
    %c0_i32 = arith.constant 0 : i32
    return %arg0, %arg2 : i32, i32
  }
  func.func @transform_1(%arg0: i32, %arg1: i32, %arg2: i32) -> (i32, i32) {
    %c0_i32 = arith.constant 0 : i32
    return %arg2, %arg1 : i32, i32
  }
  func.func @transform_2(%arg0: i32, %arg1: i32, %arg2: i32) -> (i32, i32) {
    %c0_i32 = arith.constant 0 : i32
    %c0_i32_0 = arith.constant 0 : i32
    return %c0_i32, %arg1 : i32, i32
  }
  func.func @transform_3(%arg0: i32, %arg1: i32, %arg2: i32) -> (i32, i32) {
    %c0_i32 = arith.constant 0 : i32
    return %arg0, %arg1 : i32, i32
  }
}

module attributes {stable_mosaic.version = 11 : i64} {
  func.func @_attn_kernel(%arg0: i32, %arg1: i32, %arg2: memref<8x128xbf16, #tpu.memory_space<vmem>>, %arg3: memref<16x256xbf16, #tpu.memory_space<vmem>>, %arg4: memref<8x128xbf16, #tpu.memory_space<vmem>>) attributes {dimension_semantics = [#tpu.dimension_semantics<parallel>, #tpu.dimension_semantics<parallel>], iteration_bounds = array<i64: 2, 1>, scalar_prefetch = 0 : i64, scratch_operands = 0 : i64, tpu.core_type = #tpu.core_type<tc>, window_params = [{transform_indices = @transform_0, window_bounds = array<i64: 8, 128>}, {transform_indices = @transform_1, window_bounds = array<i64: 16, 256>}, {transform_indices = @transform_2, window_bounds = array<i64: 8, 128>}]} {
    %c0 = arith.constant 0 : index
    %c0_0 = arith.constant 0 : index
    %0 = vector.load %arg2[%c0, %c0_0] : memref<8x128xbf16, #tpu.memory_space<vmem>>, vector<8x128xbf16>
    %c0_1 = arith.constant 0 : index
    %c0_2 = arith.constant 0 : index
    %1 = vector.load %arg3[%c0_1, %c0_2] : memref<16x256xbf16, #tpu.memory_space<vmem>>, vector<16x256xbf16>
    %2 = vector.extract_strided_slice %1 {offsets = [0, 0], sizes = [16, 128], strides = [1, 1]} : vector<16x256xbf16> to vector<16x128xbf16>
    %3 = vector.extract_strided_slice %1 {offsets = [0, 128], sizes = [16, 128], strides = [1, 1]} : vector<16x256xbf16> to vector<16x128xbf16>
    %4 = vector.extract_strided_slice %0 {offsets = [0, 0], sizes = [8, 32], strides = [1, 1]} : vector<8x128xbf16> to vector<8x32xbf16>
    %5 = vector.extract_strided_slice %2 {offsets = [0, 0], sizes = [16, 32], strides = [1, 1]} : vector<16x128xbf16> to vector<16x32xbf16>
    %cst = arith.constant dense<0.000000e+00> : vector<8x16xf32>
    %6 = tpu.matmul %4, %5, %cst {dimension_numbers = #tpu.dot_dimension_numbers<[1], [1], [0], [0], [0, 0, 1, 0], [], []>} : vector<8x32xbf16>, vector<16x32xbf16>, vector<8x16xf32> -> vector<8x16xf32>
    %cst_3 = arith.constant dense<0xFF800000> : vector<8xf32>
    %7 = vector.multi_reduction <maximumf>, %6, %cst_3 [1] : vector<8x16xf32> to vector<8xf32>
    %8 = vector.shape_cast %7 : vector<8xf32> to vector<8x1xf32>
    %9 = vector.broadcast %8 : vector<8x1xf32> to vector<8x16xf32>
    %10 = arith.subf %6, %9 : vector<8x16xf32>
    %11 = math.exp %10 : vector<8x16xf32>
    %cst_4 = arith.constant dense<0.000000e+00> : vector<8xf32>
    %12 = vector.multi_reduction <add>, %11, %cst_4 [1] : vector<8x16xf32> to vector<8xf32>
    %13 = vector.shape_cast %12 : vector<8xf32> to vector<8x1xf32>
    %14 = tpu.reciprocal %13 {approx = true} : vector<8x1xf32> -> vector<8x1xf32>
    %15 = vector.broadcast %14 : vector<8x1xf32> to vector<8x16xf32>
    %16 = arith.mulf %11, %15 : vector<8x16xf32>
    %17 = arith.truncf %16 : vector<8x16xf32> to vector<8x16xbf16>
    %18 = vector.extract_strided_slice %3 {offsets = [0, 0], sizes = [16, 32], strides = [1, 1]} : vector<16x128xbf16> to vector<16x32xbf16>
    %cst_5 = arith.constant dense<0.000000e+00> : vector<8x32xf32>
    %19 = tpu.matmul %17, %18, %cst_5 {dimension_numbers = #tpu.dot_dimension_numbers<[1], [0], [0], [1], [0, 0, 1, 1], [], []>} : vector<8x16xbf16>, vector<16x32xbf16>, vector<8x32xf32> -> vector<8x32xf32>
    %20 = arith.truncf %19 : vector<8x32xf32> to vector<8x32xbf16>
    %c0_6 = arith.constant 0 : index
    %c0_7 = arith.constant 0 : index
    %21 = vector.load %arg4[%c0_6, %c0_7] : memref<8x128xbf16, #tpu.memory_space<vmem>>, vector<8x32xbf16>
    tpu.vector_store %arg4[%c0_6, %c0_7], %20 {strides = array<i32>} : memref<8x128xbf16, #tpu.memory_space<vmem>>, vector<8x32xbf16>,
    %22 = vector.extract_strided_slice %0 {offsets = [0, 32], sizes = [8, 32], strides = [1, 1]} : vector<8x128xbf16> to vector<8x32xbf16>
    %23 = vector.extract_strided_slice %2 {offsets = [0, 32], sizes = [16, 32], strides = [1, 1]} : vector<16x128xbf16> to vector<16x32xbf16>
    %cst_8 = arith.constant dense<0.000000e+00> : vector<8x16xf32>
    %24 = tpu.matmul %22, %23, %cst_8 {dimension_numbers = #tpu.dot_dimension_numbers<[1], [1], [0], [0], [0, 0, 1, 0], [], []>} : vector<8x32xbf16>, vector<16x32xbf16>, vector<8x16xf32> -> vector<8x16xf32>
    %cst_9 = arith.constant dense<0xFF800000> : vector<8xf32>
    %25 = vector.multi_reduction <maximumf>, %24, %cst_9 [1] : vector<8x16xf32> to vector<8xf32>
    %26 = vector.shape_cast %25 : vector<8xf32> to vector<8x1xf32>
    %27 = vector.broadcast %26 : vector<8x1xf32> to vector<8x16xf32>
    %28 = arith.subf %24, %27 : vector<8x16xf32>
    %29 = math.exp %28 : vector<8x16xf32>
    %cst_10 = arith.constant dense<0.000000e+00> : vector<8xf32>
    %30 = vector.multi_reduction <add>, %29, %cst_10 [1] : vector<8x16xf32> to vector<8xf32>
    %31 = vector.shape_cast %30 : vector<8xf32> to vector<8x1xf32>
    %32 = tpu.reciprocal %31 {approx = true} : vector<8x1xf32> -> vector<8x1xf32>
    %33 = vector.broadcast %32 : vector<8x1xf32> to vector<8x16xf32>
    %34 = arith.mulf %29, %33 : vector<8x16xf32>
    %35 = arith.truncf %34 : vector<8x16xf32> to vector<8x16xbf16>
    %36 = vector.extract_strided_slice %3 {offsets = [0, 32], sizes = [16, 32], strides = [1, 1]} : vector<16x128xbf16> to vector<16x32xbf16>
    %cst_11 = arith.constant dense<0.000000e+00> : vector<8x32xf32>
    %37 = tpu.matmul %35, %36, %cst_11 {dimension_numbers = #tpu.dot_dimension_numbers<[1], [0], [0], [1], [0, 0, 1, 1], [], []>} : vector<8x16xbf16>, vector<16x32xbf16>, vector<8x32xf32> -> vector<8x32xf32>
    %38 = arith.truncf %37 : vector<8x32xf32> to vector<8x32xbf16>
    %c0_12 = arith.constant 0 : index
    %c32 = arith.constant 32 : index
    %39 = vector.load %arg4[%c0_12, %c32] : memref<8x128xbf16, #tpu.memory_space<vmem>>, vector<8x32xbf16>
    tpu.vector_store %arg4[%c0_12, %c32], %38 {strides = array<i32>} : memref<8x128xbf16, #tpu.memory_space<vmem>>, vector<8x32xbf16>,
    %40 = vector.extract_strided_slice %0 {offsets = [0, 64], sizes = [8, 32], strides = [1, 1]} : vector<8x128xbf16> to vector<8x32xbf16>
    %41 = vector.extract_strided_slice %2 {offsets = [0, 64], sizes = [16, 32], strides = [1, 1]} : vector<16x128xbf16> to vector<16x32xbf16>
    %cst_13 = arith.constant dense<0.000000e+00> : vector<8x16xf32>
    %42 = tpu.matmul %40, %41, %cst_13 {dimension_numbers = #tpu.dot_dimension_numbers<[1], [1], [0], [0], [0, 0, 1, 0], [], []>} : vector<8x32xbf16>, vector<16x32xbf16>, vector<8x16xf32> -> vector<8x16xf32>
    %cst_14 = arith.constant dense<0xFF800000> : vector<8xf32>
    %43 = vector.multi_reduction <maximumf>, %42, %cst_14 [1] : vector<8x16xf32> to vector<8xf32>
    %44 = vector.shape_cast %43 : vector<8xf32> to vector<8x1xf32>
    %45 = vector.broadcast %44 : vector<8x1xf32> to vector<8x16xf32>
    %46 = arith.subf %42, %45 : vector<8x16xf32>
    %47 = math.exp %46 : vector<8x16xf32>
    %cst_15 = arith.constant dense<0.000000e+00> : vector<8xf32>
    %48 = vector.multi_reduction <add>, %47, %cst_15 [1] : vector<8x16xf32> to vector<8xf32>
    %49 = vector.shape_cast %48 : vector<8xf32> to vector<8x1xf32>
    %50 = tpu.reciprocal %49 {approx = true} : vector<8x1xf32> -> vector<8x1xf32>
    %51 = vector.broadcast %50 : vector<8x1xf32> to vector<8x16xf32>
    %52 = arith.mulf %47, %51 : vector<8x16xf32>
    %53 = arith.truncf %52 : vector<8x16xf32> to vector<8x16xbf16>
    %54 = vector.extract_strided_slice %3 {offsets = [0, 64], sizes = [16, 32], strides = [1, 1]} : vector<16x128xbf16> to vector<16x32xbf16>
    %cst_16 = arith.constant dense<0.000000e+00> : vector<8x32xf32>
    %55 = tpu.matmul %53, %54, %cst_16 {dimension_numbers = #tpu.dot_dimension_numbers<[1], [0], [0], [1], [0, 0, 1, 1], [], []>} : vector<8x16xbf16>, vector<16x32xbf16>, vector<8x32xf32> -> vector<8x32xf32>
    %56 = arith.truncf %55 : vector<8x32xf32> to vector<8x32xbf16>
    %c0_17 = arith.constant 0 : index
    %c64 = arith.constant 64 : index
    %57 = vector.load %arg4[%c0_17, %c64] : memref<8x128xbf16, #tpu.memory_space<vmem>>, vector<8x32xbf16>
    tpu.vector_store %arg4[%c0_17, %c64], %56 {strides = array<i32>} : memref<8x128xbf16, #tpu.memory_space<vmem>>, vector<8x32xbf16>,
    %58 = vector.extract_strided_slice %0 {offsets = [0, 96], sizes = [8, 32], strides = [1, 1]} : vector<8x128xbf16> to vector<8x32xbf16>
    %59 = vector.extract_strided_slice %2 {offsets = [0, 96], sizes = [16, 32], strides = [1, 1]} : vector<16x128xbf16> to vector<16x32xbf16>
    %cst_18 = arith.constant dense<0.000000e+00> : vector<8x16xf32>
    %60 = tpu.matmul %58, %59, %cst_18 {dimension_numbers = #tpu.dot_dimension_numbers<[1], [1], [0], [0], [0, 0, 1, 0], [], []>} : vector<8x32xbf16>, vector<16x32xbf16>, vector<8x16xf32> -> vector<8x16xf32>
    %cst_19 = arith.constant dense<0xFF800000> : vector<8xf32>
    %61 = vector.multi_reduction <maximumf>, %60, %cst_19 [1] : vector<8x16xf32> to vector<8xf32>
    %62 = vector.shape_cast %61 : vector<8xf32> to vector<8x1xf32>
    %63 = vector.broadcast %62 : vector<8x1xf32> to vector<8x16xf32>
    %64 = arith.subf %60, %63 : vector<8x16xf32>
    %65 = math.exp %64 : vector<8x16xf32>
    %cst_20 = arith.constant dense<0.000000e+00> : vector<8xf32>
    %66 = vector.multi_reduction <add>, %65, %cst_20 [1] : vector<8x16xf32> to vector<8xf32>
    %67 = vector.shape_cast %66 : vector<8xf32> to vector<8x1xf32>
    %68 = tpu.reciprocal %67 {approx = true} : vector<8x1xf32> -> vector<8x1xf32>
    %69 = vector.broadcast %68 : vector<8x1xf32> to vector<8x16xf32>
    %70 = arith.mulf %65, %69 : vector<8x16xf32>
    %71 = arith.truncf %70 : vector<8x16xf32> to vector<8x16xbf16>
    %72 = vector.extract_strided_slice %3 {offsets = [0, 96], sizes = [16, 32], strides = [1, 1]} : vector<16x128xbf16> to vector<16x32xbf16>
    %cst_21 = arith.constant dense<0.000000e+00> : vector<8x32xf32>
    %73 = tpu.matmul %71, %72, %cst_21 {dimension_numbers = #tpu.dot_dimension_numbers<[1], [0], [0], [1], [0, 0, 1, 1], [], []>} : vector<8x16xbf16>, vector<16x32xbf16>, vector<8x32xf32> -> vector<8x32xf32>
    %74 = arith.truncf %73 : vector<8x32xf32> to vector<8x32xbf16>
    %c0_22 = arith.constant 0 : index
    %c96 = arith.constant 96 : index
    %75 = vector.load %arg4[%c0_22, %c96] : memref<8x128xbf16, #tpu.memory_space<vmem>>, vector<8x32xbf16>
    tpu.vector_store %arg4[%c0_22, %c96], %74 {strides = array<i32>} : memref<8x128xbf16, #tpu.memory_space<vmem>>, vector<8x32xbf16>,
    return
  }
  func.func @transform_0(%arg0: i32, %arg1: i32) -> (i32, i32) {
    %c0_i32 = arith.constant 0 : i32
    return %arg1, %arg0 : i32, i32
  }
  func.func @transform_1(%arg0: i32, %arg1: i32) -> (i32, i32) {
    %c0_i32 = arith.constant 0 : i32
    %c0_i32_0 = arith.constant 0 : i32
    return %c0_i32, %arg0 : i32, i32
  }
  func.func @transform_2(%arg0: i32, %arg1: i32) -> (i32, i32) {
    %c0_i32 = arith.constant 0 : i32
    return %arg1, %arg0 : i32, i32
  }
}

module attributes {stable_mosaic.version = 11 : i64} {
  func.func @_matmul_ln_kernel(%arg0: i32, %arg1: i32, %arg2: memref<16x128xbf16, #tpu.memory_space<vmem>>, %arg3: memref<128x128xbf16, #tpu.memory_space<vmem>>, %arg4: memref<1x128xf32, #tpu.memory_space<vmem>>, %arg5: memref<16x128xf32, #tpu.memory_space<vmem>>, %arg6: memref<1x128xf32, #tpu.memory_space<vmem>>, %arg7: memref<1x128xf32, #tpu.memory_space<vmem>>, %arg8: memref<16x128xbf16, #tpu.memory_space<vmem>>, %arg9: memref<16x128xf32, #tpu.memory_space<vmem>>) attributes {dimension_semantics = [#tpu.dimension_semantics<parallel>, #tpu.dimension_semantics<arbitrary>], iteration_bounds = array<i64: 1, 1>, scalar_prefetch = 0 : i64, scratch_operands = 1 : i64, tpu.core_type = #tpu.core_type<tc>, window_params = [{transform_indices = @transform_0, window_bounds = array<i64: 16, 128>}, {transform_indices = @transform_1, window_bounds = array<i64: 128, 128>}, {pipeline_mode = #tpu.pipeline_mode<synchronous>, transform_indices = @transform_2, window_bounds = array<i64: 1, 128>}, {transform_indices = @transform_3, window_bounds = array<i64: 16, 128>}, {pipeline_mode = #tpu.pipeline_mode<synchronous>, transform_indices = @transform_4, window_bounds = array<i64: 1, 128>}, {pipeline_mode = #tpu.pipeline_mode<synchronous>, transform_indices = @transform_5, window_bounds = array<i64: 1, 128>}, {transform_indices = @transform_6, window_bounds = array<i64: 16, 128>}]} {
    %c0_i32 = arith.constant 0 : i32
    %0 = arith.cmpi eq, %arg1, %c0_i32 : i32
    %1 = arith.extui %0 : i1 to i32
    %c0_i32_0 = arith.constant 0 : i32
    %2 = arith.cmpi ne, %1, %c0_i32_0 : i32
    scf.if %2 {
      %cst_10 = arith.constant 0.000000e+00 : f32
      %12 = vector.broadcast %cst_10 : f32 to vector<16x128xf32>
      %c0_11 = arith.constant 0 : index
      %c0_12 = arith.constant 0 : index
      %13 = vector.load %arg9[%c0_11, %c0_12] : memref<16x128xf32, #tpu.memory_space<vmem>>, vector<16x128xf32>
      tpu.vector_store %arg9[%c0_11, %c0_12], %12 {strides = array<i32>} : memref<16x128xf32, #tpu.memory_space<vmem>>, vector<16x128xf32>,
    } else {
    }
    %c0 = arith.constant 0 : index
    %c0_1 = arith.constant 0 : index
    %3 = vector.load %arg9[%c0, %c0_1] : memref<16x128xf32, #tpu.memory_space<vmem>>, vector<16x128xf32>
    %c0_2 = arith.constant 0 : index
    %c0_3 = arith.constant 0 : index
    %4 = vector.load %arg2[%c0_2, %c0_3] : memref<16x128xbf16, #tpu.memory_space<vmem>>, vector<16x128xbf16>
    %c0_4 = arith.constant 0 : index
    %c0_5 = arith.constant 0 : index
    %5 = vector.load %arg3[%c0_4, %c0_5] : memref<128x128xbf16, #tpu.memory_space<vmem>>, vector<128x128xbf16>
    %cst = arith.constant dense<0.000000e+00> : vector<16x128xf32>
    %6 = tpu.matmul %4, %5, %cst {dimension_numbers = #tpu.dot_dimension_numbers<[1], [0], [0], [1], [0, 0, 1, 1], [], []>} : vector<16x128xbf16>, vector<128x128xbf16>, vector<16x128xf32> -> vector<16x128xf32>
    %7 = arith.addf %3, %6 : vector<16x128xf32>
    %c0_6 = arith.constant 0 : index
    %c0_7 = arith.constant 0 : index
    %8 = vector.load %arg9[%c0_6, %c0_7] : memref<16x128xf32, #tpu.memory_space<vmem>>, vector<16x128xf32>
    tpu.vector_store %arg9[%c0_6, %c0_7], %7 {strides = array<i32>} : memref<16x128xf32, #tpu.memory_space<vmem>>, vector<16x128xf32>,
    %c0_i32_8 = arith.constant 0 : i32
    %9 = arith.cmpi eq, %arg1, %c0_i32_8 : i32
    %10 = arith.extui %9 : i1 to i32
    %c0_i32_9 = arith.constant 0 : i32
    %11 = arith.cmpi ne, %10, %c0_i32_9 : i32
    scf.if %11 {
      %c0_10 = arith.constant 0 : index
      %c0_11 = arith.constant 0 : index
      %12 = vector.load %arg9[%c0_10, %c0_11] : memref<16x128xf32, #tpu.memory_space<vmem>>, vector<16x128xf32>
      %c0_12 = arith.constant 0 : index
      %c0_13 = arith.constant 0 : index
      %13 = vector.load %arg4[%c0_12, %c0_13] : memref<1x128xf32, #tpu.memory_space<vmem>>, vector<1x128xf32>
      %14 = vector.broadcast %13 : vector<1x128xf32> to vector<16x128xf32>
      %15 = arith.addf %12, %14 : vector<16x128xf32>
      %c0_14 = arith.constant 0 : index
      %c0_15 = arith.constant 0 : index
      %16 = vector.load %arg5[%c0_14, %c0_15] : memref<16x128xf32, #tpu.memory_space<vmem>>, vector<16x128xf32>
      %17 = arith.addf %15, %16 : vector<16x128xf32>
      %cst_16 = arith.constant dense<0.000000e+00> : vector<16xf32>
      %18 = vector.multi_reduction <add>, %17, %cst_16 [1] : vector<16x128xf32> to vector<16xf32>
      %19 = vector.shape_cast %18 : vector<16xf32> to vector<16x1xf32>
      %cst_17 = arith.constant 1.280000e+02 : f32
      %20 = vector.broadcast %cst_17 : f32 to vector<16x1xf32>
      %21 = arith.divf %19, %20 : vector<16x1xf32>
      %22 = vector.broadcast %21 : vector<16x1xf32> to vector<16x128xf32>
      %23 = arith.subf %17, %22 : vector<16x128xf32>
      %24 = arith.mulf %23, %23 : vector<16x128xf32>
      %cst_18 = arith.constant dense<0.000000e+00> : vector<16xf32>
      %25 = vector.multi_reduction <add>, %24, %cst_18 [1] : vector<16x128xf32> to vector<16xf32>
      %26 = vector.shape_cast %25 : vector<16xf32> to vector<16x1xf32>
      %cst_19 = arith.constant 1.280000e+02 : f32
      %27 = vector.broadcast %cst_19 : f32 to vector<16x1xf32>
      %28 = arith.divf %26, %27 : vector<16x1xf32>
      %29 = vector.broadcast %21 : vector<16x1xf32> to vector<16x128xf32>
      %30 = arith.subf %17, %29 : vector<16x128xf32>
      %cst_20 = arith.constant 9.99999974E-6 : f32
      %31 = vector.broadcast %cst_20 : f32 to vector<16x1xf32>
      %32 = arith.addf %28, %31 : vector<16x1xf32>
      %33 = math.rsqrt %32 : vector<16x1xf32>
      %34 = vector.broadcast %33 : vector<16x1xf32> to vector<16x128xf32>
      %35 = arith.mulf %30, %34 : vector<16x128xf32>
      %c0_21 = arith.constant 0 : index
      %c0_22 = arith.constant 0 : index
      %36 = vector.load %arg6[%c0_21, %c0_22] : memref<1x128xf32, #tpu.memory_space<vmem>>, vector<1x128xf32>
      %37 = vector.broadcast %36 : vector<1x128xf32> to vector<16x128xf32>
      %38 = arith.mulf %35, %37 : vector<16x128xf32>
      %c0_23 = arith.constant 0 : index
      %c0_24 = arith.constant 0 : index
      %39 = vector.load %arg7[%c0_23, %c0_24] : memref<1x128xf32, #tpu.memory_space<vmem>>, vector<1x128xf32>
      %40 = vector.broadcast %39 : vector<1x128xf32> to vector<16x128xf32>
      %41 = arith.addf %38, %40 : vector<16x128xf32>
      %42 = arith.truncf %41 : vector<16x128xf32> to vector<16x128xbf16>
      %c0_25 = arith.constant 0 : index
      %c0_26 = arith.constant 0 : index
      %43 = vector.load %arg8[%c0_25, %c0_26] : memref<16x128xbf16, #tpu.memory_space<vmem>>, vector<16x128xbf16>
      tpu.vector_store %arg8[%c0_25, %c0_26], %42 {strides = array<i32>} : memref<16x128xbf16, #tpu.memory_space<vmem>>, vector<16x128xbf16>,
    } else {
    }
    return
  }
  func.func @transform_0(%arg0: i32, %arg1: i32) -> (i32, i32) {
    %c0_i32 = arith.constant 0 : i32
    return %arg0, %arg1 : i32, i32
  }
  func.func @transform_1(%arg0: i32, %arg1: i32) -> (i32, i32) {
    %c0_i32 = arith.constant 0 : i32
    %c0_i32_0 = arith.constant 0 : i32
    return %arg1, %c0_i32 : i32, i32
  }
  func.func @transform_2(%arg0: i32, %arg1: i32) -> (i32, i32) {
    %c0_i32 = arith.constant 0 : i32
    %c0_i32_0 = arith.constant 0 : i32
    %c0_i32_1 = arith.constant 0 : i32
    return %c0_i32, %c0_i32_0 : i32, i32
  }
  func.func @transform_3(%arg0: i32, %arg1: i32) -> (i32, i32) {
    %c0_i32 = arith.constant 0 : i32
    %c0_i32_0 = arith.constant 0 : i32
    return %arg0, %c0_i32 : i32, i32
  }
  func.func @transform_4(%arg0: i32, %arg1: i32) -> (i32, i32) {
    %c0_i32 = arith.constant 0 : i32
    %c0_i32_0 = arith.constant 0 : i32
    %c0_i32_1 = arith.constant 0 : i32
    return %c0_i32, %c0_i32_0 : i32, i32
  }
  func.func @transform_5(%arg0: i32, %arg1: i32) -> (i32, i32) {
    %c0_i32 = arith.constant 0 : i32
    %c0_i32_0 = arith.constant 0 : i32
    %c0_i32_1 = arith.constant 0 : i32
    return %c0_i32, %c0_i32_0 : i32, i32
  }
  func.func @transform_6(%arg0: i32, %arg1: i32) -> (i32, i32) {
    %c0_i32 = arith.constant 0 : i32
    %c0_i32_0 = arith.constant 0 : i32
    return %arg0, %c0_i32 : i32, i32
  }
}

module attributes {stable_mosaic.version = 11 : i64} {
  func.func @_ffn_ln_kernel(%arg0: i32, %arg1: i32, %arg2: memref<16x128xbf16, #tpu.memory_space<vmem>>, %arg3: memref<128x1024xbf16, #tpu.memory_space<vmem>>, %arg4: memref<1x1024xf32, #tpu.memory_space<vmem>>, %arg5: memref<1024x128xbf16, #tpu.memory_space<vmem>>, %arg6: memref<1x128xf32, #tpu.memory_space<vmem>>, %arg7: memref<1x128xf32, #tpu.memory_space<vmem>>, %arg8: memref<1x128xf32, #tpu.memory_space<vmem>>, %arg9: memref<16x128xf32, #tpu.memory_space<vmem>>, %arg10: memref<16x128xf32, #tpu.memory_space<vmem>>) attributes {dimension_semantics = [#tpu.dimension_semantics<parallel>, #tpu.dimension_semantics<arbitrary>], iteration_bounds = array<i64: 1, 2>, scalar_prefetch = 0 : i64, scratch_operands = 1 : i64, tpu.core_type = #tpu.core_type<tc>, window_params = [{transform_indices = @transform_0, window_bounds = array<i64: 16, 128>}, {transform_indices = @transform_1, window_bounds = array<i64: 128, 1024>}, {transform_indices = @transform_2, window_bounds = array<i64: 1, 1024>}, {transform_indices = @transform_3, window_bounds = array<i64: 1024, 128>}, {pipeline_mode = #tpu.pipeline_mode<synchronous>, transform_indices = @transform_4, window_bounds = array<i64: 1, 128>}, {pipeline_mode = #tpu.pipeline_mode<synchronous>, transform_indices = @transform_5, window_bounds = array<i64: 1, 128>}, {pipeline_mode = #tpu.pipeline_mode<synchronous>, transform_indices = @transform_6, window_bounds = array<i64: 1, 128>}, {transform_indices = @transform_7, window_bounds = array<i64: 16, 128>}]} {
    %c0_i32 = arith.constant 0 : i32
    %0 = arith.cmpi eq, %arg1, %c0_i32 : i32
    %1 = arith.extui %0 : i1 to i32
    %c0_i32_0 = arith.constant 0 : i32
    %2 = arith.cmpi ne, %1, %c0_i32_0 : i32
    scf.if %2 {
      %cst_15 = arith.constant 0.000000e+00 : f32
      %20 = vector.broadcast %cst_15 : f32 to vector<16x128xf32>
      %c0_16 = arith.constant 0 : index
      %c0_17 = arith.constant 0 : index
      %21 = vector.load %arg10[%c0_16, %c0_17] : memref<16x128xf32, #tpu.memory_space<vmem>>, vector<16x128xf32>
      tpu.vector_store %arg10[%c0_16, %c0_17], %20 {strides = array<i32>} : memref<16x128xf32, #tpu.memory_space<vmem>>, vector<16x128xf32>,
    } else {
    }
    %c0 = arith.constant 0 : index
    %c0_1 = arith.constant 0 : index
    %3 = vector.load %arg2[%c0, %c0_1] : memref<16x128xbf16, #tpu.memory_space<vmem>>, vector<16x128xbf16>
    %c0_2 = arith.constant 0 : index
    %c0_3 = arith.constant 0 : index
    %4 = vector.load %arg3[%c0_2, %c0_3] : memref<128x1024xbf16, #tpu.memory_space<vmem>>, vector<128x1024xbf16>
    %cst = arith.constant dense<0.000000e+00> : vector<16x1024xf32>
    %5 = tpu.matmul %3, %4, %cst {dimension_numbers = #tpu.dot_dimension_numbers<[1], [0], [0], [1], [0, 0, 1, 1], [], []>} : vector<16x128xbf16>, vector<128x1024xbf16>, vector<16x1024xf32> -> vector<16x1024xf32>
    %c0_4 = arith.constant 0 : index
    %c0_5 = arith.constant 0 : index
    %6 = vector.load %arg4[%c0_4, %c0_5] : memref<1x1024xf32, #tpu.memory_space<vmem>>, vector<1x1024xf32>
    %7 = vector.broadcast %6 : vector<1x1024xf32> to vector<16x1024xf32>
    %8 = arith.addf %5, %7 : vector<16x1024xf32>
    %cst_6 = arith.constant 0.000000e+00 : f32
    %9 = vector.broadcast %cst_6 : f32 to vector<16x1024xf32>
    %10 = arith.maximumf %8, %9 : vector<16x1024xf32>
    %c0_7 = arith.constant 0 : index
    %c0_8 = arith.constant 0 : index
    %11 = vector.load %arg10[%c0_7, %c0_8] : memref<16x128xf32, #tpu.memory_space<vmem>>, vector<16x128xf32>
    %12 = arith.truncf %10 : vector<16x1024xf32> to vector<16x1024xbf16>
    %c0_9 = arith.constant 0 : index
    %c0_10 = arith.constant 0 : index
    %13 = vector.load %arg5[%c0_9, %c0_10] : memref<1024x128xbf16, #tpu.memory_space<vmem>>, vector<1024x128xbf16>
    %cst_11 = arith.constant dense<0.000000e+00> : vector<16x128xf32>
    %14 = tpu.matmul %12, %13, %cst_11 {dimension_numbers = #tpu.dot_dimension_numbers<[1], [0], [0], [1], [0, 0, 1, 1], [], []>} : vector<16x1024xbf16>, vector<1024x128xbf16>, vector<16x128xf32> -> vector<16x128xf32>
    %15 = arith.addf %11, %14 : vector<16x128xf32>
    %c0_12 = arith.constant 0 : index
    %c0_13 = arith.constant 0 : index
    %16 = vector.load %arg10[%c0_12, %c0_13] : memref<16x128xf32, #tpu.memory_space<vmem>>, vector<16x128xf32>
    tpu.vector_store %arg10[%c0_12, %c0_13], %15 {strides = array<i32>} : memref<16x128xf32, #tpu.memory_space<vmem>>, vector<16x128xf32>,
    %c1_i32 = arith.constant 1 : i32
    %17 = arith.cmpi eq, %arg1, %c1_i32 : i32
    %18 = arith.extui %17 : i1 to i32
    %c0_i32_14 = arith.constant 0 : i32
    %19 = arith.cmpi ne, %18, %c0_i32_14 : i32
    scf.if %19 {
      %c0_15 = arith.constant 0 : index
      %c0_16 = arith.constant 0 : index
      %20 = vector.load %arg10[%c0_15, %c0_16] : memref<16x128xf32, #tpu.memory_space<vmem>>, vector<16x128xf32>
      %c0_17 = arith.constant 0 : index
      %c0_18 = arith.constant 0 : index
      %21 = vector.load %arg6[%c0_17, %c0_18] : memref<1x128xf32, #tpu.memory_space<vmem>>, vector<1x128xf32>
      %22 = vector.broadcast %21 : vector<1x128xf32> to vector<16x128xf32>
      %23 = arith.addf %20, %22 : vector<16x128xf32>
      %24 = arith.extf %3 : vector<16x128xbf16> to vector<16x128xf32>
      %25 = arith.addf %23, %24 : vector<16x128xf32>
      %cst_19 = arith.constant dense<0.000000e+00> : vector<16xf32>
      %26 = vector.multi_reduction <add>, %25, %cst_19 [1] : vector<16x128xf32> to vector<16xf32>
      %27 = vector.shape_cast %26 : vector<16xf32> to vector<16x1xf32>
      %cst_20 = arith.constant 1.280000e+02 : f32
      %28 = vector.broadcast %cst_20 : f32 to vector<16x1xf32>
      %29 = arith.divf %27, %28 : vector<16x1xf32>
      %30 = vector.broadcast %29 : vector<16x1xf32> to vector<16x128xf32>
      %31 = arith.subf %25, %30 : vector<16x128xf32>
      %32 = arith.mulf %31, %31 : vector<16x128xf32>
      %cst_21 = arith.constant dense<0.000000e+00> : vector<16xf32>
      %33 = vector.multi_reduction <add>, %32, %cst_21 [1] : vector<16x128xf32> to vector<16xf32>
      %34 = vector.shape_cast %33 : vector<16xf32> to vector<16x1xf32>
      %cst_22 = arith.constant 1.280000e+02 : f32
      %35 = vector.broadcast %cst_22 : f32 to vector<16x1xf32>
      %36 = arith.divf %34, %35 : vector<16x1xf32>
      %37 = vector.broadcast %29 : vector<16x1xf32> to vector<16x128xf32>
      %38 = arith.subf %25, %37 : vector<16x128xf32>
      %cst_23 = arith.constant 9.99999974E-6 : f32
      %39 = vector.broadcast %cst_23 : f32 to vector<16x1xf32>
      %40 = arith.addf %36, %39 : vector<16x1xf32>
      %41 = math.rsqrt %40 : vector<16x1xf32>
      %42 = vector.broadcast %41 : vector<16x1xf32> to vector<16x128xf32>
      %43 = arith.mulf %38, %42 : vector<16x128xf32>
      %c0_24 = arith.constant 0 : index
      %c0_25 = arith.constant 0 : index
      %44 = vector.load %arg7[%c0_24, %c0_25] : memref<1x128xf32, #tpu.memory_space<vmem>>, vector<1x128xf32>
      %45 = vector.broadcast %44 : vector<1x128xf32> to vector<16x128xf32>
      %46 = arith.mulf %43, %45 : vector<16x128xf32>
      %c0_26 = arith.constant 0 : index
      %c0_27 = arith.constant 0 : index
      %47 = vector.load %arg8[%c0_26, %c0_27] : memref<1x128xf32, #tpu.memory_space<vmem>>, vector<1x128xf32>
      %48 = vector.broadcast %47 : vector<1x128xf32> to vector<16x128xf32>
      %49 = arith.addf %46, %48 : vector<16x128xf32>
      %c0_28 = arith.constant 0 : index
      %c0_29 = arith.constant 0 : index
      %50 = vector.load %arg9[%c0_28, %c0_29] : memref<16x128xf32, #tpu.memory_space<vmem>>, vector<16x128xf32>
      tpu.vector_store %arg9[%c0_28, %c0_29], %49 {strides = array<i32>} : memref<16x128xf32, #tpu.memory_space<vmem>>, vector<16x128xf32>,
    } else {
    }
    return
  }
  func.func @transform_0(%arg0: i32, %arg1: i32) -> (i32, i32) {
    %c0_i32 = arith.constant 0 : i32
    %c0_i32_0 = arith.constant 0 : i32
    return %arg0, %c0_i32 : i32, i32
  }
  func.func @transform_1(%arg0: i32, %arg1: i32) -> (i32, i32) {
    %c0_i32 = arith.constant 0 : i32
    %c0_i32_0 = arith.constant 0 : i32
    return %c0_i32, %arg1 : i32, i32
  }
  func.func @transform_2(%arg0: i32, %arg1: i32) -> (i32, i32) {
    %c0_i32 = arith.constant 0 : i32
    %c0_i32_0 = arith.constant 0 : i32
    return %c0_i32, %arg1 : i32, i32
  }
  func.func @transform_3(%arg0: i32, %arg1: i32) -> (i32, i32) {
    %c0_i32 = arith.constant 0 : i32
    %c0_i32_0 = arith.constant 0 : i32
    return %arg1, %c0_i32 : i32, i32
  }
  func.func @transform_4(%arg0: i32, %arg1: i32) -> (i32, i32) {
    %c0_i32 = arith.constant 0 : i32
    %c0_i32_0 = arith.constant 0 : i32
    %c0_i32_1 = arith.constant 0 : i32
    return %c0_i32, %c0_i32_0 : i32, i32
  }
  func.func @transform_5(%arg0: i32, %arg1: i32) -> (i32, i32) {
    %c0_i32 = arith.constant 0 : i32
    %c0_i32_0 = arith.constant 0 : i32
    %c0_i32_1 = arith.constant 0 : i32
    return %c0_i32, %c0_i32_0 : i32, i32
  }
  func.func @transform_6(%arg0: i32, %arg1: i32) -> (i32, i32) {
    %c0_i32 = arith.constant 0 : i32
    %c0_i32_0 = arith.constant 0 : i32
    %c0_i32_1 = arith.constant 0 : i32
    return %c0_i32, %c0_i32_0 : i32, i32
  }
  func.func @transform_7(%arg0: i32, %arg1: i32) -> (i32, i32) {
    %c0_i32 = arith.constant 0 : i32
    %c0_i32_0 = arith.constant 0 : i32
    return %arg0, %c0_i32 : i32, i32
  }
}

</mosaic_0001>

<bundles_post_ra>
// kernel: transformer_decoder_layer.6
= control target key start
LH: loop header
LB: loop body
LE: loop exit
PB: predicated region body
PF: predicated region fallthrough
CT: control target
= control target key end

     0   :  { %8 = vsyncpa [#allocation4], 0  ;;  %s497_s0 = inlined_call_operand.hbm [shape: f32[32,128], index: 0, kind: input, shape index: {}]   ;;  %s498_s1 = inlined_call_operand.hbm [shape: bf16[128,256], index: 1, kind: input, shape index: {}]   ;;  %s499_s2 = inlined_call_operand.hbm [shape: f32[1,256], index: 2, kind: input, shape index: {}]   ;;  %s500_s3 = inlined_call_operand.vmem [shape: bf16[32,256], index: 3, kind: output, shape index: {}]  }
   0x1   :  { %9 = vsyncpa [#allocation6], 0  ;;  %s27_s14 = sshll.u32 %s498_s1, 4  ;;  %s451_s15 = smov [#allocation5]   ;;  %s28_s14 = int_to_ptr.hbm [resolvable:$true] %s27_s14 }
   0x2   :  { %s29_s16 = sshll.u32 %s451_s15, 4  ;;  %s14_s19 = sshll.u32 %s497_s0, 4  ;;  %s30_s16 = int_to_ptr.vmem [resolvable:$true] %s29_s16  ;;  %s15_s19 = int_to_ptr.hbm [resolvable:$true] %s14_s19 }
   0x3   :  { %s452_s20 = smov 128   ;;  %s453_s21 = smov 8  }
   0x4   :  { %35 = dma.hbm_to_vmem [thread:$0]  %s28_s14, 2048, %s30_s16, [#allocation6], %s452_s20, %s452_s20, %s453_s21  }
   0x5   :  { %s454_s22 = smov [#allocation3]   ;;  %s41_s26 = sshll.u32 %s499_s2, 4  ;;  %s42_s26 = int_to_ptr.hbm [resolvable:$true] %s41_s26 }
   0x6   :  { %s16_s23 = sshll.u32 %s454_s22, 4  ;;  %s455_s1 = smov [#allocation7]   ;;  %s17_s23 = int_to_ptr.vmem [resolvable:$true] %s16_s23 }
   0x7   :  { %22 = dma.hbm_to_vmem [thread:$0]  %s15_s19, 512, %s17_s23, [#allocation4], %s452_s20, %s452_s20, %s453_s21  }
   0x8   :  { %s43_s27 = sshll.u32 %s455_s1, 4  ;;  %s44_s27 = int_to_ptr.vmem [resolvable:$true] %s43_s27 }
   0x9   :  { %46 = dma.hbm_to_vmem [thread:$0]  %s42_s26, 32, %s44_s27, [#allocation6]  }
   0xa   :  { %447 = dma.done.wait [#allocation4], 512  }
   0xb   :  { %448 = vsyncadd [#allocation4], 4294966784 }
   0xc   :  { %449 = dma.done.wait [#allocation6], 2080  }
   0xd   :  { %450 = vsyncadd [#allocation6], 4294965216  ;;  %v332_v0 = vld [vmem:[#allocation5 + $0x70] sm:$0xf]  ;;  %v353_v1 = vld [vmem:[#allocation5 + $0x74] sm:$0xf0] }
   0xe   :  { %v352_v2 = vld [vmem:[#allocation5 + $0x74] sm:$0xf]  ;;  %v333_v3 = vor.u32 %v353_v1, %v332_v0  ;;  %v334_v4 = vld [vmem:[#allocation5 + $0x78] sm:$0xf0]  ;;  %v324_v5 = vld [vmem:[#allocation5 + $0x60] sm:$0xf] }
   0xf   :  { %v351_v6 = vld [vmem:[#allocation5 + $0x64] sm:$0xf0]  ;;  %v337_v7 = vor.u32 %v352_v2, %v334_v4  ;;  %v350_v8 = vld [vmem:[#allocation5 + $0x64] sm:$0xf]  ;;  %v326_v9 = vld [vmem:[#allocation5 + $0x68] sm:$0xf0] }
  0x10   :  { %181 = vmatpush.bf16.msra.mxu0 %v333_v3  ;;  %354 = vmatpush.bf16.msra.mxu2 %v333_v3  ;;  %v325_v10 = vor.u32 %v351_v6, %v324_v5  ;;  %v329_v11 = vor.u32 %v350_v8, %v326_v9  ;;  %v316_v12 = vld [vmem:[#allocation5 + $0x50] sm:$0xf]  ;;  %v349_v13 = vld [vmem:[#allocation5 + $0x54] sm:$0xf0]  ;;  %v348_v14 = vld [vmem:[#allocation5 + $0x54] sm:$0xf] }
  0x11   :  { %200 = vmatpush.bf16.msra.mxu1 %v337_v7  ;;  %362 = vmatpush.bf16.msra.mxu3 %v337_v7  ;;  %v318_v15 = vld [vmem:[#allocation5 + $0x58] sm:$0xf0]  ;;  %v317_v16 = vor.u32 %v349_v13, %v316_v12  ;;  %v308_v18 = vld [vmem:[#allocation5 + $0x40] sm:$0xf]  ;;  %v347_v19 = vld [vmem:[#allocation5 + $0x44] sm:$0xf0] }
  0x12   :  { %v321_v17 = vor.u32 %v348_v14, %v318_v15  ;;  %v346_v20 = vld [vmem:[#allocation5 + $0x44] sm:$0xf]  ;;  %v310_v21 = vld [vmem:[#allocation5 + $0x48] sm:$0xf0]  ;;  %v309_v22 = vor.u32 %v347_v19, %v308_v18  ;;  %v300_v24 = vld [vmem:[#allocation5 + $0x30] sm:$0xf] }
  0x13   :  { %v313_v23 = vor.u32 %v346_v20, %v310_v21  ;;  %v345_v25 = vld [vmem:[#allocation5 + $0x34] sm:$0xf0]  ;;  %v344_v26 = vld [vmem:[#allocation5 + $0x34] sm:$0xf]  ;;  %v302_v27 = vld [vmem:[#allocation5 + $0x38] sm:$0xf0] }
  0x14   :  { %182 = vmatpush.bf16.msra.mxu0 %v325_v10  ;;  %355 = vmatpush.bf16.msra.mxu2 %v325_v10  ;;  %v301_v28 = vor.u32 %v345_v25, %v300_v24  ;;  %v305_v29 = vor.u32 %v344_v26, %v302_v27  ;;  %v292_v30 = vld [vmem:[#allocation5 + $0x20] sm:$0xf]  ;;  %v343_v31 = vld [vmem:[#allocation5 + $0x24] sm:$0xf0]  ;;  %v342_v32 = vld [vmem:[#allocation5 + $0x24] sm:$0xf] }
  0x15   :  { %201 = vmatpush.bf16.msra.mxu1 %v329_v11  ;;  %363 = vmatpush.bf16.msra.mxu3 %v329_v11  ;;  %v294_v33 = vld [vmem:[#allocation5 + $0x28] sm:$0xf0]  ;;  %v293_v34 = vor.u32 %v343_v31, %v292_v30  ;;  %v284_v36 = vld [vmem:[#allocation5 + $0x10] sm:$0xf]  ;;  %v341_v37 = vld [vmem:[#allocation5 + $0x14] sm:$0xf0] }
  0x16   :  { %v297_v35 = vor.u32 %v342_v32, %v294_v33  ;;  %v340_v38 = vld [vmem:[#allocation5 + $0x14] sm:$0xf]  ;;  %v286_v39 = vld [vmem:[#allocation5 + $0x18] sm:$0xf0]  ;;  %v285_v40 = vor.u32 %v341_v37, %v284_v36  ;;  %v276_v42 = vld [vmem:[#allocation5] sm:$0xf] }
  0x17   :  { %v289_v41 = vor.u32 %v340_v38, %v286_v39  ;;  %v339_v43 = vld [vmem:[#allocation5 + $0x4] sm:$0xf0]  ;;  %v338_v44 = vld [vmem:[#allocation5 + $0x4] sm:$0xf]  ;;  %v278_v45 = vld [vmem:[#allocation5 + $0x8] sm:$0xf0] }
  0x18   :  { %183 = vmatpush.bf16.msra.mxu0 %v317_v16  ;;  %356 = vmatpush.bf16.msra.mxu2 %v317_v16  ;;  %v79_v46 = vld [vmem:[#allocation3] sm:$0xff]  ;;  %v277_v47 = vor.u32 %v339_v43, %v276_v42  ;;  %v80_v48 = vld [vmem:[#allocation3 + $0x8] sm:$0xff]  ;;  %v81_v49 = vld [vmem:[#allocation3 + $0x10] sm:$0xff]  ;;  %v281_v51 = vor.u32 %v338_v44, %v278_v45 }
  0x19   :  { %202 = vmatpush.bf16.msra.mxu1 %v321_v17  ;;  %364 = vmatpush.bf16.msra.mxu3 %v321_v17  ;;  %v82_v50 = vld [vmem:[#allocation3 + $0x18] sm:$0xff]  ;;  %v83_v52 = vpack.c.bf16 %v80_v48, %v79_v46  ;;  %v246_v54 = vld [vmem:[#allocation7] sm:$0x3] }
  0x1a   :  { %v84_v53 = vpack.c.bf16 %v82_v50, %v81_v49  ;;  %v248_v55 = vperm.slane %v246_v54, 0  ;;  %v249_v56 = vperm.slane %v246_v54, 1 }
  0x1c   :  { %184 = vmatpush.bf16.msra.mxu0 %v309_v22  ;;  %357 = vmatpush.bf16.msra.mxu2 %v309_v22 }
  0x1d   :  { %203 = vmatpush.bf16.msra.mxu1 %v313_v23  ;;  %365 = vmatpush.bf16.msra.mxu3 %v313_v23 }
  0x20   :  { %185 = vmatpush.bf16.msra.mxu0 %v301_v28  ;;  %358 = vmatpush.bf16.msra.mxu2 %v301_v28 }
  0x21   :  { %204 = vmatpush.bf16.msra.mxu1 %v305_v29  ;;  %366 = vmatpush.bf16.msra.mxu3 %v305_v29 }
  0x24   :  { %186 = vmatpush.bf16.msra.mxu0 %v293_v34  ;;  %359 = vmatpush.bf16.msra.mxu2 %v293_v34 }
  0x25   :  { %205 = vmatpush.bf16.msra.mxu1 %v297_v35  ;;  %367 = vmatpush.bf16.msra.mxu3 %v297_v35 }
  0x28   :  { %187 = vmatpush.bf16.msra.mxu0 %v285_v40  ;;  %360 = vmatpush.bf16.msra.mxu2 %v285_v40 }
  0x29   :  { %206 = vmatpush.bf16.msra.mxu1 %v289_v41  ;;  %368 = vmatpush.bf16.msra.mxu3 %v289_v41 }
  0x2c   :  { %188 = vmatpush.bf16.msra.mxu0 %v277_v47  ;;  %361 = vmatpush.bf16.msra.mxu2 %v277_v47 }
  0x2d   :  { %207 = vmatpush.bf16.msra.mxu1 %v281_v51  ;;  %369 = vmatpush.bf16.msra.mxu3 %v281_v51 }
  0x2f   :  { %189 = vmatmul.bf16.vlgmr.msra.gmra.mxu0 %v83_v52  ;;  %194 = vmatmul.bf16.vlgmr.msra.gmra.mxu2 %v84_v53 }
  0x30   :  { %208 = vmatmul.bf16.vlgmr.msra.gmra.mxu1 %v83_v52  ;;  %213 = vmatmul.bf16.vlgmr.msra.gmra.mxu3 %v84_v53 }
  0xac   :  { %v190_v57 = vpop.f32.mrf.mxu0 }
  0xad   :  { %v252_v58 = vadd.f32 %v248_v55, %v190_v57  ;;  %v209_v59 = vpop.f32.mrf.mxu1 }
  0xae   :  { %v253_v60 = vadd.f32 %v249_v56, %v209_v59 }
  0xb0   :  { %v260_v61 = vpack.c.bf16 %v253_v60, %v252_v58 }
  0xb2   :  { %264 = vst [vmem:[%s500_s3] sm:$0xff] %v260_v61  ;;  %v195_v62 = vpop.f32.mrf.mxu2 }
  0xb3   :  { %v256_v63 = vadd.f32 %v248_v55, %v195_v62  ;;  %v214_v0 = vpop.f32.mrf.mxu3 }
  0xb4   :  { %v257_v1 = vadd.f32 %v249_v56, %v214_v0  ;;  %v192_v2 = vpop.f32.mrf.mxu0 }
  0xb5   :  { %v254_v3 = vadd.f32 %v248_v55, %v192_v2  ;;  %v211_v4 = vpop.f32.mrf.mxu1 }
  0xb6   :  { %v262_v5 = vpack.c.bf16 %v257_v1, %v256_v63  ;;  %v255_v6 = vadd.f32 %v249_v56, %v211_v4 }
  0xb8   :  { %266 = vst [vmem:[%s500_s3 + $0x10] sm:$0xff] %v262_v5  ;;  %v261_v7 = vpack.c.bf16 %v255_v6, %v254_v3 }
  0xba   :  { %265 = vst [vmem:[%s500_s3 + $0x8] sm:$0xff] %v261_v7  ;;  %v197_v8 = vpop.f32.mrf.mxu2 }
  0xbb   :  { %v258_v9 = vadd.f32 %v248_v55, %v197_v8  ;;  %v216_v10 = vpop.f32.mrf.mxu3 }
  0xbc   :  { %v259_v11 = vadd.f32 %v249_v56, %v216_v10 }
  0xbe   :  { %v263_v12 = vpack.c.bf16 %v259_v11, %v258_v9 }
  0xc0   :  { %267 = vst [vmem:[%s500_s3 + $0x18] sm:$0xff] %v263_v12 }
  0xc1   :  { %272 = vsyncpa [#allocation4], 1 }
  0xc2   :  { %273 = vsyncpa [#allocation6], 1 }

// kernel: transformer_decoder_layer.5
= control target key start
LH: loop header
LB: loop body
LE: loop exit
PB: predicated region body
PF: predicated region fallthrough
CT: control target
= control target key end

     0   :  { %8 = vsyncpa [#allocation4], 0  ;;  %s341_s0 = inlined_call_operand.hbm [shape: f32[16,128], index: 0, kind: input, shape index: {}]   ;;  %s342_s1 = inlined_call_operand.hbm [shape: bf16[128,128], index: 1, kind: input, shape index: {}]   ;;  %s343_s2 = inlined_call_operand.hbm [shape: f32[1,128], index: 2, kind: input, shape index: {}]   ;;  %s344_s3 = inlined_call_operand.vmem [shape: bf16[16,128], index: 3, kind: output, shape index: {}]  }
   0x1   :  { %9 = vsyncpa [#allocation6], 0  ;;  %s27_s14 = sshll.u32 %s342_s1, 4  ;;  %s302_s15 = smov [#allocation5]   ;;  %s28_s14 = int_to_ptr.hbm [resolvable:$true] %s27_s14 }
   0x2   :  { %s29_s16 = sshll.u32 %s302_s15, 4  ;;  %s14_s19 = sshll.u32 %s341_s0, 4  ;;  %s30_s16 = int_to_ptr.vmem [resolvable:$true] %s29_s16  ;;  %s15_s19 = int_to_ptr.hbm [resolvable:$true] %s14_s19 }
   0x3   :  { %s303_s20 = smov 64   ;;  %s304_s21 = smov 4  }
   0x4   :  { %35 = dma.hbm_to_vmem [thread:$0]  %s28_s14, 1024, %s30_s16, [#allocation6], %s303_s20, %s303_s20, %s304_s21  }
   0x5   :  { %s305_s22 = smov [#allocation3]   ;;  %s306_s24 = smov 128  }
   0x6   :  { %s16_s23 = sshll.u32 %s305_s22, 4  ;;  %s307_s25 = smov 8   ;;  %s17_s23 = int_to_ptr.vmem [resolvable:$true] %s16_s23 }
   0x7   :  { %22 = dma.hbm_to_vmem [thread:$0]  %s15_s19, 256, %s17_s23, [#allocation4], %s306_s24, %s306_s24, %s307_s25  }
   0x8   :  { %s41_s27 = sshll.u32 %s343_s2, 4  ;;  %s308_s28 = smov [#allocation7]   ;;  %s42_s27 = int_to_ptr.hbm [resolvable:$true] %s41_s27 }
   0x9   :  { %s43_s29 = sshll.u32 %s308_s28, 4  ;;  %s44_s29 = int_to_ptr.vmem [resolvable:$true] %s43_s29 }
   0xa   :  { %46 = dma.hbm_to_vmem [thread:$0]  %s42_s27, 16, %s44_s29, [#allocation6]  }
   0xb   :  { %298 = dma.done.wait [#allocation4], 256  }
   0xc   :  { %299 = vsyncadd [#allocation4], 4294967040 }
   0xd   :  { %300 = dma.done.wait [#allocation6], 1040  }
   0xe   :  { %301 = vsyncadd [#allocation6], 4294966256  ;;  %v212_v0 = vld [vmem:[#allocation5 + $0x38] sm:$0xff]  ;;  %v211_v1 = vld [vmem:[#allocation5 + $0x30] sm:$0xff] }
   0xf   :  { %134 = vmatpush.bf16.msra.mxu0 %v212_v0  ;;  %v210_v2 = vld [vmem:[#allocation5 + $0x28] sm:$0xff]  ;;  %v209_v3 = vld [vmem:[#allocation5 + $0x20] sm:$0xff]  ;;  %v208_v4 = vld [vmem:[#allocation5 + $0x18] sm:$0xff] }
  0x10   :  { %v207_v5 = vld [vmem:[#allocation5 + $0x10] sm:$0xff]  ;;  %v206_v6 = vld [vmem:[#allocation5 + $0x8] sm:$0xff]  ;;  %v205_v7 = vld [vmem:[#allocation5] sm:$0xff] }
  0x11   :  { %v67_v8 = vld [vmem:[#allocation3] sm:$0xff]  ;;  %v68_v9 = vld [vmem:[#allocation3 + $0x8] sm:$0xff]  ;;  %v225_v12 = vld [vmem:[#allocation7] ss:$0 sm:$0xff] }
  0x12   :  { %v69_v10 = vpack.c.bf16 %v68_v9, %v67_v8 }
  0x13   :  { %135 = vmatpush.bf16.msra.mxu0 %v211_v1 }
  0x17   :  { %136 = vmatpush.bf16.msra.mxu0 %v210_v2 }
  0x1b   :  { %137 = vmatpush.bf16.msra.mxu0 %v209_v3 }
  0x1f   :  { %138 = vmatpush.bf16.msra.mxu0 %v208_v4 }
  0x23   :  { %139 = vmatpush.bf16.msra.mxu0 %v207_v5 }
  0x27   :  { %140 = vmatpush.bf16.msra.mxu0 %v206_v6 }
  0x2b   :  { %141 = vmatpush.bf16.msra.mxu0 %v205_v7 }
  0x2e   :  { %142 = vmatmul.bf16.vlgmr.msra.gmra.mxu0 %v69_v10 }
  0xab   :  { %v143_v11 = vpop.f32.mrf.mxu0 }
  0xac   :  { %v161_v14 = vadd.f32 %v225_v12, %v143_v11 }
  0xb3   :  { %v145_v13 = vpop.f32.mrf.mxu0 }
  0xb4   :  { %v162_v15 = vadd.f32 %v225_v12, %v145_v13 }
  0xb6   :  { %v216_v16 = vpack.c.bf16 %v162_v15, %v161_v14 }
  0xb8   :  { %217 = vst [vmem:[%s344_s3] sm:$0xff] %v216_v16  }
  0xb9   :  { %171 = vsyncpa [#allocation4], 1 }
  0xba   :  { %172 = vsyncpa [#allocation6], 1 }

// kernel: transformer_decoder_layer.8
= control target key start
LH: loop header
LB: loop body
LE: loop exit
PB: predicated region body
PF: predicated region fallthrough
CT: control target
= control target key end

     0   :  { %v263_v18 = vmov 128.0   ;;  %s344_s1 = inlined_call_operand.vmem [shape: bf16[128,128], index: 1, kind: input, shape index: {}]   ;;  %s345_s2 = inlined_call_operand.vmem [shape: f32[1,128], index: 2, kind: input, shape index: {}]   ;;  %s346_s0 = inlined_call_operand.vmem [shape: bf16[16,128], index: 0, kind: input, shape index: {}]   ;;  %s347_s3 = inlined_call_operand.vmem [shape: f32[16,128], index: 3, kind: input, shape index: {}]   ;;  %s348_s4 = inlined_call_operand.vmem [shape: f32[1,128], index: 4, kind: input, shape index: {}]   ;;  %s349_s5 = inlined_call_operand.vmem [shape: f32[1,128], index: 5, kind: input, shape index: {}]   ;;  %s350_s6 = inlined_call_operand.vmem [shape: bf16[16,128], index: 6, kind: output, shape index: {}]  }
   0x1   :  { %v247_v0 = vld [vmem:[%s344_s1 + $0x38] sm:$0xff]  ;;  %v246_v1 = vld [vmem:[%s344_s1 + $0x30] sm:$0xff]  ;;  %v245_v2 = vld [vmem:[%s344_s1 + $0x28] sm:$0xff]  ;;  %257 = vrcp.f32 %v263_v18 }
   0x2   :  { %103 = vmatpush.bf16.msra.mxu0 %v247_v0  ;;  %v244_v3 = vld [vmem:[%s344_s1 + $0x20] sm:$0xff]  ;;  %v243_v4 = vld [vmem:[%s344_s1 + $0x18] sm:$0xff]  ;;  %v242_v5 = vld [vmem:[%s344_s1 + $0x10] sm:$0xff] }
   0x3   :  { %v241_v6 = vld [vmem:[%s344_s1 + $0x8] sm:$0xff]  ;;  %v240_v7 = vld [vmem:[%s344_s1] sm:$0xff] }
   0x4   :  { %v239_v8 = vld [vmem:[%s346_s0] sm:$0xff]  ;;  %v133_v15 = vld [vmem:[%s347_s3 + $0x8] sm:$0xff] }
   0x5   :  { %v254_v9 = vld [vmem:[%s345_s2] ss:$0 sm:$0xff] }
   0x6   :  { %104 = vmatpush.bf16.msra.mxu0 %v246_v1  ;;  %v132_v11 = vld [vmem:[%s347_s3] sm:$0xff] }
   0x7   :  { %v258_v19 = vpop.eup %257  ;;  %v255_v51 = vld [vmem:[%s348_s4] ss:$0 sm:$0xff] }
   0x8   :  { %v141_v20 = vmul.f32 128.0, %v258_v19  ;;  %vm145_vm0 = vweird.f32 %v258_v19  ;;  %v256_v55 = vld [vmem:[%s349_s5] ss:$0 sm:$0xff] }
   0xa   :  { %105 = vmatpush.bf16.msra.mxu0 %v245_v2  ;;  %v142_v21 = vsub.f32 1.0, %v141_v20 }
   0xc   :  { %v143_v22 = vmul.f32 %v258_v19, %v142_v21 }
   0xe   :  { %106 = vmatpush.bf16.msra.mxu0 %v244_v3  ;;  %v144_v23 = vadd.f32 %v258_v19, %v143_v22 }
  0x10   :  { %v146_v24 = vsel %vm145_vm0, %v258_v19, %v144_v23 }
  0x12   :  { %107 = vmatpush.bf16.msra.mxu0 %v243_v4 }
  0x16   :  { %108 = vmatpush.bf16.msra.mxu0 %v242_v5 }
  0x1a   :  { %109 = vmatpush.bf16.msra.mxu0 %v241_v6 }
  0x1e   :  { %110 = vmatpush.bf16.msra.mxu0 %v240_v7 }
  0x21   :  { %111 = vmatmul.bf16.vlgmr.msra.gmra.mxu0 %v239_v8 }
  0x9e   :  { %v112_v10 = vpop.f32.mrf.mxu0 }
  0x9f   :  { %v130_v12 = vadd.f32 %v254_v9, %v112_v10 }
  0xa1   :  { %v134_v13 = vadd.f32 %v132_v11, %v130_v12 }
  0xa3   :  { %136 = vadd.xlane.f32.xlu0 %v134_v13 }
  0xa6   :  { %v114_v14 = vpop.f32.mrf.mxu0 }
  0xa7   :  { %v131_v16 = vadd.f32 %v254_v9, %v114_v14 }
  0xa9   :  { %v135_v17 = vadd.f32 %v133_v15, %v131_v16 }
  0xab   :  { %138 = vadd.xlane.f32.xlu0 %v135_v17 }
 0x116   :  { %v137_v25 = vpop.xlane.xlu0 %136 }
 0x117   :  { %v147_v26 = vmul.f32 %v146_v24, %v137_v25 }
 0x119   :  { %v149_v27 = vsub.f32 %v134_v13, %v147_v26 }
 0x11b   :  { %v151_v28 = vmul.f32 %v149_v27, %v149_v27 }
 0x11d   :  { %153 = vadd.xlane.f32.xlu1 %v151_v28 }
 0x11e   :  { %v139_v29 = vpop.xlane.xlu0 %138 }
 0x11f   :  { %v148_v30 = vmul.f32 %v146_v24, %v139_v29 }
 0x121   :  { %v150_v31 = vsub.f32 %v135_v17, %v148_v30 }
 0x123   :  { %v152_v32 = vmul.f32 %v150_v31, %v150_v31 }
 0x125   :  { %155 = vadd.xlane.f32.xlu1 %v152_v32 }
 0x190   :  { %v154_v33 = vpop.xlane.xlu1 %153 }
 0x191   :  { %v157_v34 = vmul.f32 %v154_v33, %v146_v24 }
 0x193   :  { %v159_v35 = vadd.f32 1e-05, %v157_v34 }
 0x195   :  { %259 = vrsqrt.f32 %v159_v35  ;;  %vm167_vm2 = vweird.f32 %v159_v35 }
 0x198   :  { %v156_v36 = vpop.xlane.xlu1 %155 }
 0x199   :  { %v158_v37 = vmul.f32 %v156_v36, %v146_v24 }
 0x19b   :  { %v260_v38 = vpop.eup %259  ;;  %v160_v39 = vadd.f32 1e-05, %v158_v37 }
 0x19c   :  { %v162_v40 = vmul.f32 %v260_v38, %v159_v35  ;;  %vm168_vm1 = vweird.f32 %v260_v38 }
 0x19d   :  { %261 = vrsqrt.f32 %v160_v39  ;;  %vm169_vm3 = vmor %vm167_vm2, %vm168_vm1  ;;  %vm177_vm5 = vweird.f32 %v160_v39 }
 0x19e   :  { %v163_v41 = vmul.f32 %v260_v38, %v162_v40 }
 0x1a0   :  { %v164_v42 = vmul.f32 0.5, %v163_v41 }
 0x1a2   :  { %v165_v43 = vsub.f32 1.5, %v164_v42 }
 0x1a3   :  { %v262_v44 = vpop.eup %261 }
 0x1a4   :  { %v166_v45 = vmul.f32 %v260_v38, %v165_v43  ;;  %v172_v46 = vmul.f32 %v262_v44, %v160_v39  ;;  %vm178_vm4 = vweird.f32 %v262_v44 }
 0x1a5   :  { %vm179_vm6 = vmor %vm177_vm5, %vm178_vm4 }
 0x1a6   :  { %v173_v47 = vmul.f32 %v262_v44, %v172_v46  ;;  %v170_v48 = vsel %vm169_vm3, %v260_v38, %v166_v45 }
 0x1a7   :  { %v181_v52 = vmul.f32 %v170_v48, %v149_v27 }
 0x1a8   :  { %v174_v49 = vmul.f32 0.5, %v173_v47 }
 0x1a9   :  { %v187_v56 = vmul.f32 %v255_v51, %v181_v52 }
 0x1aa   :  { %v175_v50 = vsub.f32 1.5, %v174_v49 }
 0x1ab   :  { %v193_v59 = vadd.f32 %v256_v55, %v187_v56 }
 0x1ac   :  { %v176_v53 = vmul.f32 %v262_v44, %v175_v50 }
 0x1ae   :  { %v180_v54 = vsel %vm179_vm6, %v262_v44, %v176_v53 }
 0x1af   :  { %v182_v57 = vmul.f32 %v180_v54, %v150_v31 }
 0x1b1   :  { %v188_v58 = vmul.f32 %v255_v51, %v182_v57 }
 0x1b3   :  { %v194_v60 = vadd.f32 %v256_v55, %v188_v58 }
 0x1b5   :  { %v251_v61 = vpack.c.bf16 %v194_v60, %v193_v59 }
 0x1b7   :  { %252 = vst [vmem:[%s350_s6] sm:$0xff] %v251_v61  }

// kernel: transformer_decoder_layer.7
= control target key start
LH: loop header
LB: loop body
LE: loop exit
PB: predicated region body
PF: predicated region fallthrough
CT: control target
= control target key end

     0   :  { %s737_s9 = smov 0   ;;  %s739_s10 = smov 0   ;;  %s857_s0 = inlined_call_operand.vmem [shape: bf16[8,256], index: 0, kind: input, shape index: {}]   ;;  %s858_s1 = inlined_call_operand.vmem [shape: bf16[16,512], index: 1, kind: input, shape index: {}]   ;;  %s859_s2 = inlined_call_operand.vmem [shape: bf16[8,256], index: 2, kind: output, shape index: {}]  }
   0x1   :  { %s741_s11 = smov 0   ;;  %s743_s12 = smov 0  }
   0x2   :  { %s745_s13 = smov 0  }
   0x3 LB: > { %s24_s14 = sadd.s32 1, %s713_s12  ;;  %p66_p1 = scmp.ne.s32.totalorder %s705_s10, %s701_s9  ;;  %s717_s13 = sphi %s745_s13, %s12_s13   ;;  %s713_s12 = sphi %s743_s12, %s863_s12   ;;  %s709_s11 = sphi %s741_s11, %s862_s11   ;;  %s705_s10 = sphi %s739_s10, %s861_s10   ;;  %s701_s9 = sphi %s737_s9, %s860_s9  }
   0x4   : > { %p26_p0 = scmp.ge.s32.totalorder %s24_s14, 2  ;;  %p67_p2 = scmp.eq.s32.totalorder %s717_s13, 0 }
   0x5   : > { %s59_s16 = sadd.s32 1, %s705_s10  ;;  %p591_p5 = scmp.ge.s32.totalorder %s717_s13, 2 }
   0x6   : > { %s865_s14 = smov (%p26_p0, %s24_s14), 0  ;;  %p68_p3 = por %p67_p2, %p66_p1 }
   0x7   : > { %s56_s15 = ssub.s32 %s713_s12, %s865_s14  ;;  %120 = sbr.rel (%p591_p5) target bundleno = 18 (0x12), region = 16 }
   0x8   : > { %p57_p4 = scmp.eq.s32.totalorder %s56_s15, 0 }
   0xa   : > { %s772_s17 = scalar_select %p57_p4, %s705_s10, %s59_s16  }
   0xc   : > { %134 = sbr.rel (!%p68_p3) target bundleno = 18 (0x12), region = 24  ;;  %s136_s18 = sand.u32 (%p68_p3), 1, %s705_s10  }
   0xd   : > { %s617_s19 = sshll.u32 (%p68_p3), %s713_s12, 3  ;;  %s592_s20 = sshll.u32 (%p68_p3), %s136_s18, 4 }
   0xe   : > { %s141_s23 = scalar_lea.vmem (%p68_p3), %s858_s1, %s617_s19  ;;  %s138_s24 = scalar_lea.vmem (%p68_p3), [#allocation2], %s592_s20 }
   0xf   : > { %v172_v0 = vld [vmem:[%s141_s23] sm:$0xff] (%p68_p3)  ;;  %v174_v1 = vld [vmem:[%s141_s23 + $0x10] sm:$0xff] (%p68_p3) }
  0x10   : > { %173 = vst [vmem:[%s138_s24] sm:$0xff] (%p68_p3), %v172_v0 }
  0x11   : > { %175 = vst [vmem:[%s138_s24 + $0x8] sm:$0xff] %v174_v1 }
  0x12 PF: > { %p595_p6 = scmp.ge.s32.totalorder %s717_s13, 1  ;;  %p180_p7 = scmp.lt.s32.totalorder %s717_s13, 3 }
  0x14   : > { %p181_p8 = pnand %p595_p6, %p180_p7 }
  0x15   : > { %s187_s25 = sand.u32 (!%p181_p8), 1, %s701_s9   ;;  %p221_p9 = scmp.lt.s32.totalorder (!%p181_p8), %s709_s11, 1 }
  0x16   : > { %184 = sbr.rel (%p181_p8) target bundleno = 1090 (0x442), region = 62  ;;  %s596_s26 = sshll.u32 (!%p181_p8), %s187_s25, 4 }
  0x17   : > { %s784_s27 = scalar_lea.vmem (!%p181_p8), [#allocation2], %s596_s26  ;;  %s719_s4 = smov (!%p181_p8), 64  }
  0x18   : > { %s720_s5 = smov (!%p181_p8), 32   ;;  %s721_s6 = smov (!%p181_p8), 96  }
  0x1b   : > { %v601_v2 = vld [vmem:[%s784_s27] sm:$0xf]  ;;  %v619_v3 = vld [vmem:[%s784_s27 + $0x4] sm:$0xf0]  ;;  %vm245_vm0 = vcmask 261120   ;;  %s867_s11 = smov (!%p221_p9, %s709_s11), 1 }
  0x1c   : > { %v602_v4 = vor.u32 %v619_v3, %v601_v2  ;;  %s597_s28 = sshll.u32 %s867_s11, 2  ;;  %vm265_vm1 = vcmask 130048   ;;  %v618_v22 = vld [vmem:[%s784_s27 + $0x4] sm:$0xf]  ;;  %v604_v23 = vld [vmem:[%s784_s27 + $0x8] sm:$0xf0] }
  0x1d   : > { %s226_s3 = scalar_lea.vmem %s857_s0, %s597_s28  ;;  %v607_v24 = vor.u32 %v618_v22, %v604_v23  ;;  %s822_s9 = scalar_lea.vmem %s859_s2, %s597_s28  ;;  %vm299_vm2 = vcmask 257024   ;;  %vm363_vm3 = vcmask 519424   ;;  %vm424_vm4 = vcmask 781824  }
  0x1e   : > { %v250_v5 = vsel %vm245_vm0, %v602_v4, 0  ;;  %v237_v6 = vld [vmem:[%s226_s3] sm:$0xf]  ;;  %367 = vrot.lane.b32.xlu2 %v602_v4, %s719_s4  ;;  %vm485_vm5 = vcmask 1044224  }
  0x1f   : > { %259 = vmatpush.bf16.xpose.msra.mxu0 %v250_v5  ;;  %v302_v7 = vunpack.c.l.b16 %v237_v6  ;;  %292 = vmatpush.bf16.msra.mxu1 %v607_v24 }
  0x21   : > { %v303_v8 = vpack.c.b16 %v302_v7, %v302_v7 }
  0x26   : > { %603 = vmatmul.msk.bf16.vlgmr.msra.gmra.mxu0 %vm245_vm0, %v237_v6  ;;  %428 = vrot.lane.b32.xlu2 %v602_v4, %s720_s5 }
  0x2e   : > { %365 = vrot.lane.b32.xlu2 %v303_v8, %s719_s4 }
  0x36   : > { %426 = vrot.lane.b32.xlu2 %v303_v8, %s720_s5 }
  0x78   : > { %v368_v12 = vpop.permute.xlu2 %367 }
  0x79   : > { %v373_v26 = vsel %vm245_vm0, %v368_v12, 0 }
  0x7a   : > { %382 = vmatpush.bf16.xpose.msrb.mxu1 %v373_v26 }
  0x80   : > { %v429_v13 = vpop.permute.xlu2 %428 }
  0x81   : > { %v434_v18 = vsel %vm245_vm0, %v429_v13, 0 }
  0x82   : > { %443 = vmatpush.bf16.xpose.msrb.mxu0 %v434_v18 }
  0x88   : > { %v366_v17 = vpop.permute.xlu2 %365 }
  0x90   : > { %v427_v21 = vpop.permute.xlu2 %426 }
  0x91   : > { %613 = vmatmul.msk.bf16.vlgmr.msrb.gmra.mxu0 %vm245_vm0, %v427_v21 }
  0xa3   : > { %v261_v9 = vpop.f32.mrf.mxu0 }
  0xa4   : > { %v266_v10 = vsel %vm265_vm1, %v261_v9, -inf }
  0xa5   : > { %267 = vmax.xlane.f32.xlu0 %v266_v10 }
  0xab   : > { %v263_v11 = vpop.f32.mrf.mxu0 }
  0xb9   : > { %306 = vrot.lane.b32.xlu0 %v602_v4, %s721_s6 }
 0x10e   : > { %v445_v32 = vpop.f32.mrf.mxu0 }
 0x10f   : > { %v449_v33 = vsel %vm265_vm1, %v445_v32, -inf }
 0x116   : > { %v447_v34 = vpop.f32.mrf.mxu0 }
 0x118   : > { %v268_v14 = vpop.xlane.xlu0 %267 }
 0x119   : > { %v269_v15 = vsub.f32 %v261_v9, %v268_v14 }
 0x11b   : > { %v270_v16 = vmul.f32 1.442695, %v269_v15 }
 0x11d   : > { %663 = vpow2.f32 %v270_v16 }
 0x123   : > { %v664_v19 = vpop.eup %663 }
 0x124   : > { %v272_v20 = vsel %vm265_vm1, %v664_v19, 0.0 }
 0x125   : > { %273 = vadd.xlane.f32.xlu1 %v272_v20 }
 0x12b   : > { %v307_v25 = vpop.permute.xlu0 %306 }
 0x12c   : > { %v312_v27 = vsel %vm245_vm0, %v307_v25, 0 }
 0x12d   : > { %321 = vmatpush.bf16.xpose.msra.mxu2 %v312_v27 }
 0x13e   : > { %304 = vrot.lane.b32.xlu1 %v303_v8, %s721_s6 }
 0x168   : > { %450 = vmax.xlane.f32.xlu1 %v449_v33 }
 0x198   : > { %v274_v28 = vpop.xlane.xlu1 %273 }
 0x199   : > { %665 = vrcp.f32 %v274_v28 }
 0x19f   : > { %v666_v29 = vpop.eup %665 }
 0x1a0   : > { %v276_v30 = vmul.f32 %v666_v29, %v664_v19 }
 0x1a2   : > { %v277_v31 = vpack.c.bf16 %v276_v30, %v276_v30 }
 0x1a4   : > { %608 = vmatmul.msk.bf16.vlgmr.msra.gmra.mxu1 %vm265_vm1, %v277_v31 }
 0x1b0   : > { %v305_v35 = vpop.permute.xlu1 %304 }
 0x1b1   : > { %609 = vmatmul.msk.bf16.vlgmr.msra.gmra.mxu2 %vm245_vm0, %v305_v35 }
 0x1b4   : > { %611 = vmatmul.msk.bf16.vlgmr.msrb.gmra.mxu1 %vm245_vm0, %v366_v17 }
 0x1db   : > { %v451_v47 = vpop.xlane.xlu1 %450 }
 0x1dc   : > { %v452_v51 = vsub.f32 %v445_v32, %v451_v47 }
 0x1de   : > { %v453_v53 = vmul.f32 1.442695, %v452_v51 }
 0x221   : > { %v294_v36 = vpop.f32.mrf.mxu1 }
 0x222   : > { %v298_v37 = vpack.c.bf16 %v294_v36, %v294_v36 }
 0x224   : > { %300 = vst.msk [vmem:[%s822_s9] sm:$0xf] %vm299_vm2, %v298_v37 }
 0x229   : > { %v296_v38 = vpop.f32.mrf.mxu1 }
 0x231   : > { %v384_v39 = vpop.f32.mrf.mxu1 }
 0x232   : > { %v388_v40 = vsel %vm265_vm1, %v384_v39, -inf }
 0x233   : > { %389 = vmax.xlane.f32.xlu2 %v388_v40 }
 0x234   : > { %v323_v41 = vpop.f32.mrf.mxu2 }
 0x235   : > { %v327_v42 = vsel %vm265_vm1, %v323_v41, -inf }
 0x236   : > { %328 = vmax.xlane.f32.xlu0 %v327_v42 }
 0x239   : > { %v386_v43 = vpop.f32.mrf.mxu1 }
 0x23c   : > { %v325_v44 = vpop.f32.mrf.mxu2 }
 0x24b   : > { %339 = vrot.lane.b32.xlu2 %v607_v24, %s721_s6 }
 0x2a6   : > { %v390_v45 = vpop.xlane.xlu2 %389 }
 0x2a7   : > { %v391_v46 = vsub.f32 %v384_v39, %v390_v45 }
 0x2a9   : > { %v392_v48 = vmul.f32 1.442695, %v391_v46  ;;  %v329_v49 = vpop.xlane.xlu0 %328 }
 0x2aa   : > { %v330_v50 = vsub.f32 %v323_v41, %v329_v49 }
 0x2ab   : > { %667 = vpow2.f32 %v392_v48 }
 0x2ac   : > { %v331_v52 = vmul.f32 1.442695, %v330_v50 }
 0x2ae   : > { %669 = vpow2.f32 %v331_v52  ;;  %v340_v60 = vpop.permute.xlu2 %339 }
 0x2af   : > { %671 = vpow2.f32 %v453_v53  ;;  %352 = vmatpush.bf16.msra.mxu3 %v340_v60 }
 0x2b1   : > { %v668_v54 = vpop.eup %667 }
 0x2b2   : > { %v394_v55 = vsel %vm265_vm1, %v668_v54, 0.0 }
 0x2b3   : > { %395 = vadd.xlane.f32.xlu1 %v394_v55 }
 0x2b4   : > { %v670_v56 = vpop.eup %669 }
 0x2b5   : > { %v333_v57 = vsel %vm265_vm1, %v670_v56, 0.0  ;;  %v672_v58 = vpop.eup %671 }
 0x2b6   : > { %334 = vadd.xlane.f32.xlu0 %v333_v57  ;;  %v455_v59 = vsel %vm265_vm1, %v672_v58, 0.0 }
 0x2be   : > { %456 = vadd.xlane.f32.xlu0 %v455_v59 }
 0x2cc   : > { %400 = vrot.lane.b32.xlu1 %v607_v24, %s719_s4 }
 0x2d2   : > { %461 = vrot.lane.b32.xlu0 %v607_v24, %s720_s5 }
 0x326   : > { %v396_v0 = vpop.xlane.xlu1 %395 }
 0x329   : > { %v335_v61 = vpop.xlane.xlu0 %334 }
 0x32a   : > { %673 = vrcp.f32 %v335_v61 }
 0x32b   : > { %675 = vrcp.f32 %v396_v0 }
 0x330   : > { %v674_v62 = vpop.eup %673 }
 0x331   : > { %v337_v63 = vmul.f32 %v674_v62, %v670_v56  ;;  %v457_v2 = vpop.xlane.xlu0 %456  ;;  %v676_v3 = vpop.eup %675 }
 0x332   : > { %677 = vrcp.f32 %v457_v2  ;;  %v398_v6 = vmul.f32 %v676_v3, %v668_v54 }
 0x333   : > { %v338_v1 = vpack.c.bf16 %v337_v63, %v337_v63 }
 0x334   : > { %v399_v8 = vpack.c.bf16 %v398_v6, %v398_v6 }
 0x335   : > { %610 = vmatmul.msk.bf16.vlgmr.msra.gmra.mxu3 %vm265_vm1, %v338_v1 }
 0x338   : > { %v678_v5 = vpop.eup %677 }
 0x339   : > { %v459_v7 = vmul.f32 %v678_v5, %v672_v58 }
 0x33b   : > { %v460_v10 = vpack.c.bf16 %v459_v7, %v459_v7 }
 0x33e   : > { %v401_v4 = vpop.permute.xlu1 %400 }
 0x33f   : > { %413 = vmatpush.bf16.msrb.mxu3 %v401_v4 }
 0x344   : > { %v462_v9 = vpop.permute.xlu0 %461 }
 0x345   : > { %612 = vmatmul.msk.bf16.vlgmr.msrb.gmra.mxu3 %vm265_vm1, %v399_v8  ;;  %474 = vmatpush.bf16.msrb.mxu2 %v462_v9 }
 0x348   : > { %614 = vmatmul.msk.bf16.vlgmr.msrb.gmra.mxu2 %vm265_vm1, %v460_v10 }
 0x3b8   : > { %v354_v11 = vpop.f32.mrf.mxu3 }
 0x3b9   : > { %v358_v12 = vpack.c.bf16 %v354_v11, %v354_v11 }
 0x3bb   : > { %360 = vrot.lane.b32.xlu2 %v358_v12, %s720_s5 }
 0x3c0   : > { %v356_v13 = vpop.f32.mrf.mxu3 }
 0x3c8   : > { %v415_v14 = vpop.f32.mrf.mxu3 }
 0x3c9   : > { %v419_v15 = vpack.c.bf16 %v415_v14, %v415_v14 }
 0x3cb   : > { %v476_v16 = vpop.f32.mrf.mxu2  ;;  %421 = vrot.lane.b32.xlu2 %v419_v15, %s719_s4 }
 0x3cc   : > { %v480_v17 = vpack.c.bf16 %v476_v16, %v476_v16 }
 0x3ce   : > { %482 = vrot.lane.b32.xlu0 %v480_v17, %s721_s6 }
 0x3d0   : > { %v417_v18 = vpop.f32.mrf.mxu3 }
 0x3d3   : > { %v478_v19 = vpop.f32.mrf.mxu2 }
 0x415   : > { %v361_v20 = vpop.permute.xlu2 %360 }
 0x416   : > { %364 = vst.msk [vmem:[%s822_s9] sm:$0xf] %vm363_vm3, %v361_v20 }
 0x425   : > { %v422_v21 = vpop.permute.xlu2 %421 }
 0x426   : > { %425 = vst.msk [vmem:[%s822_s9] sm:$0xf] %vm424_vm4, %v422_v21 }
 0x440   : > { %v483_v22 = vpop.permute.xlu0 %482 }
 0x441   : > { %486 = vst.msk [vmem:[%s822_s9] sm:$0xf] %vm485_vm5, %v483_v22 }
 0x442 PF: > { %s12_s13 = sadd.s32 1, %s717_s13   ;;  %s860_s9 = smov %s705_s10 }
 0x443   : > { %p9_p10 = scmp.ge.s32.totalorder %s12_s13, 4   ;;  %s861_s10 = smov %s772_s17 }
 0x444   : > { %s862_s11 = smov %s713_s12  ;;  %s863_s12 = smov %s865_s14 }
 0x445   :  { %11 = sbr.rel (!%p9_p10) target bundleno = 3 (0x3), region = 104 }

// kernel: transformer_decoder_layer.9
= control target key start
LH: loop header
LB: loop body
LE: loop exit
PB: predicated region body
PF: predicated region fallthrough
CT: control target
= control target key end

     0   :  { %s3081_s0 = inlined_call_operand.vmem [shape: bf16[16,128], index: 0, kind: input, shape index: {}]   ;;  %s3082_s1 = inlined_call_operand.hbm [shape: bf16[128,2048], index: 1, kind: input, shape index: {}]   ;;  %s3083_s2 = inlined_call_operand.vmem [shape: f32[1,2048], index: 2, kind: input, shape index: {}]   ;;  %s3084_s3 = inlined_call_operand.hbm [shape: bf16[2048,128], index: 3, kind: input, shape index: {}]   ;;  %s3085_s4 = inlined_call_operand.vmem [shape: f32[1,128], index: 4, kind: input, shape index: {}]   ;;  %s3086_s5 = inlined_call_operand.vmem [shape: f32[1,128], index: 5, kind: input, shape index: {}]   ;;  %s3087_s6 = inlined_call_operand.vmem [shape: f32[1,128], index: 6, kind: input, shape index: {}]   ;;  %s3088_s7 = inlined_call_operand.hbm [shape: f32[16,128], index: 7, kind: output, shape index: {}]  }
   0x1   :  { %3092 = sst [smem:[#allocation15_spill]] %s3082_s1 }
   0x2   :  { %12 = vsyncpa [#allocation4], 0 }
   0x3   :  { %14 = vsyncpa [#allocation4 + $0x1], 0 }
   0x4   :  { %15 = vsyncpa [#allocation7], 0 }
   0x5   :  { %17 = vsyncpa [#allocation7 + $0x1], 0 }
   0x6   :  { %18 = vsyncpa [#allocation5], 0  ;;  %s2721_s24 = smov 0   ;;  %s2723_s25 = smov 0  }
   0x7   :  { %s2725_s26 = smov 0   ;;  %s2727_s27 = smov 0  }
   0x8   :  { %s2729_s28 = smov 0   ;;  %s2731_s29 = smov 0  }
   0x9 LB: > { %3093 = sst [smem:[#allocation12_spill]] %s2657_s26  ;;  %s3089_s30 = sadd.s32 4294967295, %s2669_s29   ;;  %s2669_s29 = sphi %s2731_s29, %s24_s29   ;;  %s2665_s28 = sphi %s2729_s28, %s3107_s28   ;;  %s2661_s27 = sphi %s2727_s27, %s3106_s27   ;;  %s2657_s26 = sphi %s2725_s26, %s3102_s26   ;;  %s2653_s25 = sphi %s2723_s25, %s3105_s25   ;;  %s2649_s24 = sphi %s2721_s24, %s3104_s24  }
   0xa   : > { %s33_s8 = sadd.s32 1, %s2665_s28  ;;  %s69_s9 = sadd.s32 1, %s2657_s26 }
   0xb   : > { %p34_p0 = scmp.ge.s32.totalorder %s33_s8, 2  ;;  %p76_p1 = scmp.ne.s32.totalorder %s2657_s26, %s2653_s25 }
   0xc   : > { %p77_p2 = scmp.eq.s32.totalorder %s2669_s29, 0  ;;  %p82_p4 = scmp.ne.s32.totalorder %s2653_s25, %s2649_s24 }
   0xd   : > { %s3109_s8 = smov (%p34_p0, %s33_s8), 0  ;;  %p83_p5 = scmp.eq.s32.totalorder %s3089_s30, 0 }
   0xe   : > { %3094 = sst [smem:[#allocation13_spill]] %s3109_s8  ;;  %p2757_p3 = por %p77_p2, %p76_p1 }
   0xf   : > { %s66_s11 = ssub.s32 %s2665_s28, %s3109_s8  ;;  %p2766_p7 = por %p83_p5, %p82_p4 }
  0x10   : > { %p67_p6 = scmp.eq.s32.totalorder %s66_s11, 0  ;;  %p2453_p8 = scmp.lt.s32.totalorder %s2669_s29, 2 }
  0x11   : > { %s2775_s14 = sand.u32 1, %s2657_s26   ;;  %s2307_s15 = sshll.u32 %s2665_s28, 5 }
  0x12   : > { %s2772_s13 = scalar_select %p67_p6, %s2657_s26, %s69_s9  }
  0x13   : > { %s1775_s16 = sshll.u32 %s2775_s14, 9  ;;  %s3098_s1 = sld [smem:[#allocation15_spill]] }
  0x14   : > { %3097 = sst [smem:[#allocation14_spill]] %s2772_s13  ;;  %s269_s21 = scalar_lea.vmem [#allocation3], %s1775_s16 }
  0x15   : > { %s277_s22 = sshll.u32 %s269_s21, 4  ;;  %p2784_p9 = pnand %p2453_p8, %p2757_p3  ;;  %s278_s22 = int_to_ptr.vmem [resolvable:$true] %s277_s22 }
  0x16   : > { %p1781_p10 = scmp.ge.s32.totalorder %s2669_s29, 1  ;;  %s266_s24 = scalar_lea.sflag [#allocation4], %s2775_s14 }
  0x17   : > { %s2671_s9 = smov 1024   ;;  %s2672_s11 = smov 512  }
  0x18   : > { %s2673_s30 = smov 32   ;;  %p315_p11 = scmp.lt.s32.totalorder %s2669_s29, 3 }
  0x19   : > { %s274_s19 = scalar_lea.hbm %s3098_s1, %s2307_s15  ;;  %s2308_s15 = sshll.u32 %s2665_s28, 9 }
  0x1a   : > { %s275_s20 = sshll.u32 %s274_s19, 4  ;;  %p316_p12 = pnand %p1781_p10, %p315_p11  ;;  %s276_s20 = int_to_ptr.hbm [resolvable:$true] %s275_s20 }
  0x1b   : > { %2449 = dma.hbm_to_vmem [thread:$0]  (!%p2784_p9), %s276_s20, 8192, %s278_s22, %s266_s24, %s2671_s9, %s2672_s11, %s2673_s30  }
  0x1c   : > { %s304_s10 = scalar_lea.hbm %s3084_s3, %s2308_s15  ;;  %s299_s21 = scalar_lea.vmem [#allocation6], %s1775_s16 }
  0x1d   : > { %s305_s19 = sshll.u32 %s304_s10, 4  ;;  %s307_s1 = sshll.u32 %s299_s21, 4  ;;  %s306_s19 = int_to_ptr.hbm [resolvable:$true] %s305_s19  ;;  %s308_s1 = int_to_ptr.vmem [resolvable:$true] %s307_s1 }
  0x1e   : > { %s296_s8 = scalar_lea.sflag [#allocation7], %s2775_s14  ;;  %s2674_s13 = smov 64  }
  0x1f   : > { %s2675_s26 = smov 4   ;;  %319 = sbr.rel (%p316_p12) target bundleno = 699 (0x2bb), region = 48 }
  0x20   : > { %2452 = dma.hbm_to_vmem [thread:$0]  (!%p2784_p9), %s306_s19, 8192, %s308_s1, %s296_s8, %s2674_s13, %s2674_s13, %s2675_s26  }
  0x21   : > { %s321_s30 = sand.u32 (!%p316_p12), 1, %s2653_s25  }
  0x22   : > { %s1782_s20 = sshll.u32 (!%p316_p12), %s321_s30, 9  ;;  %s322_s22 = scalar_lea.sflag (!%p316_p12), [#allocation4], %s321_s30 }
  0x23   : > { %s2801_s24 = scalar_lea.vmem (!%p316_p12), [#allocation3], %s1782_s20 }
  0x24   : > { %2636 = dma.done.wait (%p2766_p7), %s322_s22, 8192  }
  0x25   : > { %2638 = vsyncadd (%p2766_p7), %s322_s22, 4294959104  ;;  %s332_s16 = scalar_lea.sflag [#allocation7], %s321_s30  ;;  %s2807_s14 = scalar_lea.vmem [#allocation6], %s1782_s20 }
  0x26   : > { %2640 = dma.done.wait (%p2766_p7), %s332_s16, 8192  }
  0x27   : > { %2642 = vsyncadd (%p2766_p7), %s332_s16, 4294959104  ;;  %s1784_s1 = sshll.u32 %s2661_s27, 3  ;;  %p1785_p0 = scmp.ne.s32.totalorder %s2661_s27, 0 }
  0x28   : > { %p384_p13 = scmp.lt.s32.totalorder %s1784_s1, 15 }
  0x29   : > { %393 = sbr.rel (%p1785_p0) target bundleno = 49 (0x31), region = 60 }
  0x2a   : > { %s3111_s1 = smov (!%p384_p13, %s1784_s1), 15 }
  0x2b   : > { %s386_s13 = scalar_lea.vmem %s3083_s2, %s3111_s1 }
  0x2e   : > { %v2676_v0 = vmov 0.0  }
  0x2f   : > { %394 = vst [vmem:[#allocation2] sm:$0xff] %v2676_v0 }
  0x30   : > { %395 = vst [vmem:[#allocation2 + $0x8] sm:$0xff] %v2676_v0 }
  0x31 PF: > { %v2824_v1 = vld [vmem:[%s3081_s0] sm:$0xff]   ;;  %v2016_v2 = vld [vmem:[%s2801_s24 + $0x1c0] sm:$0xf]  ;;  %v2366_v5 = vld [vmem:[%s2801_s24 + $0x1c4] sm:$0xf]  ;;  %p2302_p1 = scmp.ne.s32.totalorder %s2661_s27, 1 }
  0x32   : > { %v2370_v3 = vld [vmem:[%s2801_s24 + $0x1dc] sm:$0xf0]  ;;  %v2018_v6 = vld [vmem:[%s2801_s24 + $0x1e0] sm:$0xf0]  ;;  %v2024_v7 = vld [vmem:[%s2801_s24 + $0x1c8] sm:$0xf] }
  0x33   : > { %v2017_v4 = vor.u32 %v2370_v3, %v2016_v2  ;;  %v2021_v8 = vor.u32 %v2366_v5, %v2018_v6  ;;  %v2371_v9 = vld [vmem:[%s2801_s24 + $0x1e4] sm:$0xf0]  ;;  %v2367_v10 = vld [vmem:[%s2801_s24 + $0x1cc] sm:$0xf]  ;;  %v1984_v14 = vld [vmem:[%s2801_s24 + $0x180] sm:$0xf] }
  0x34   : > { %v2026_v11 = vld [vmem:[%s2801_s24 + $0x1e8] sm:$0xf0]  ;;  %v2025_v12 = vor.u32 %v2371_v9, %v2024_v7  ;;  %v2362_v15 = vld [vmem:[%s2801_s24 + $0x19c] sm:$0xf0]  ;;  %v2358_v16 = vld [vmem:[%s2801_s24 + $0x184] sm:$0xf] }
  0x35   : > { %806 = vmatpush.bf16.msra.mxu0 %v2017_v4  ;;  %v2029_v13 = vor.u32 %v2367_v10, %v2026_v11  ;;  %820 = vmatpush.bf16.msra.mxu1 %v2021_v8  ;;  %v1985_v17 = vor.u32 %v2362_v15, %v1984_v14  ;;  %v1986_v18 = vld [vmem:[%s2801_s24 + $0x1a0] sm:$0xf0]  ;;  %v1992_v19 = vld [vmem:[%s2801_s24 + $0x188] sm:$0xf]  ;;  %v2359_v23 = vld [vmem:[%s2801_s24 + $0x18c] sm:$0xf] }
  0x36   : > { %v2363_v20 = vld [vmem:[%s2801_s24 + $0x1a4] sm:$0xf0]  ;;  %834 = vmatpush.bf16.msra.mxu2 %v2025_v12  ;;  %v1989_v21 = vor.u32 %v2358_v16, %v1986_v18  ;;  %v1994_v24 = vld [vmem:[%s2801_s24 + $0x1a8] sm:$0xf0]  ;;  %v1952_v25 = vld [vmem:[%s2801_s24 + $0x140] sm:$0xf] }
  0x37   : > { %848 = vmatpush.bf16.msra.mxu3 %v2029_v13  ;;  %v1993_v22 = vor.u32 %v2363_v20, %v1992_v19  ;;  %v1997_v26 = vor.u32 %v2359_v23, %v1994_v24  ;;  %v2354_v27 = vld [vmem:[%s2801_s24 + $0x15c] sm:$0xf0]  ;;  %v2350_v28 = vld [vmem:[%s2801_s24 + $0x144] sm:$0xf]  ;;  %v1960_v31 = vld [vmem:[%s2801_s24 + $0x148] sm:$0xf] }
  0x38   : > { %v1954_v29 = vld [vmem:[%s2801_s24 + $0x160] sm:$0xf0]  ;;  %v1953_v30 = vor.u32 %v2354_v27, %v1952_v25  ;;  %v2355_v32 = vld [vmem:[%s2801_s24 + $0x164] sm:$0xf0]  ;;  %v2351_v33 = vld [vmem:[%s2801_s24 + $0x14c] sm:$0xf] }
  0x39   : > { %807 = vmatpush.bf16.msra.mxu0 %v1985_v17  ;;  %821 = vmatpush.bf16.msra.mxu1 %v1989_v21  ;;  %v1957_v34 = vor.u32 %v2350_v28, %v1954_v29  ;;  %v1962_v35 = vld [vmem:[%s2801_s24 + $0x168] sm:$0xf0]  ;;  %v1920_v36 = vld [vmem:[%s2801_s24 + $0x100] sm:$0xf]  ;;  %v1961_v38 = vor.u32 %v2355_v32, %v1960_v31  ;;  %v2342_v40 = vld [vmem:[%s2801_s24 + $0x104] sm:$0xf] }
  0x3a   : > { %v2346_v37 = vld [vmem:[%s2801_s24 + $0x11c] sm:$0xf0]  ;;  %835 = vmatpush.bf16.msra.mxu2 %v1993_v22  ;;  %v1965_v39 = vor.u32 %v2351_v33, %v1962_v35  ;;  %v1922_v41 = vld [vmem:[%s2801_s24 + $0x120] sm:$0xf0]  ;;  %v1928_v42 = vld [vmem:[%s2801_s24 + $0x108] sm:$0xf] }
  0x3b   : > { %849 = vmatpush.bf16.msra.mxu3 %v1997_v26  ;;  %v2347_v43 = vld [vmem:[%s2801_s24 + $0x124] sm:$0xf0]  ;;  %v2343_v44 = vld [vmem:[%s2801_s24 + $0x10c] sm:$0xf]  ;;  %v1921_v46 = vor.u32 %v2346_v37, %v1920_v36  ;;  %v1925_v47 = vor.u32 %v2342_v40, %v1922_v41  ;;  %v1888_v48 = vld [vmem:[%s2801_s24 + $0xc0] sm:$0xf] }
  0x3c   : > { %v1930_v45 = vld [vmem:[%s2801_s24 + $0x128] sm:$0xf0]  ;;  %v2338_v49 = vld [vmem:[%s2801_s24 + $0xdc] sm:$0xf0]  ;;  %v1929_v50 = vor.u32 %v2347_v43, %v1928_v42  ;;  %v2334_v52 = vld [vmem:[%s2801_s24 + $0xc4] sm:$0xf] }
  0x3d   : > { %808 = vmatpush.bf16.msra.mxu0 %v1953_v30  ;;  %822 = vmatpush.bf16.msra.mxu1 %v1957_v34  ;;  %v1933_v51 = vor.u32 %v2343_v44, %v1930_v45  ;;  %v1890_v53 = vld [vmem:[%s2801_s24 + $0xe0] sm:$0xf0]  ;;  %v1896_v54 = vld [vmem:[%s2801_s24 + $0xc8] sm:$0xf]  ;;  %v2335_v56 = vld [vmem:[%s2801_s24 + $0xcc] sm:$0xf]  ;;  %v1889_v58 = vor.u32 %v2338_v49, %v1888_v48 }
  0x3e   : > { %836 = vmatpush.bf16.msra.mxu2 %v1961_v38  ;;  %v2339_v55 = vld [vmem:[%s2801_s24 + $0xe4] sm:$0xf0]  ;;  %v1898_v57 = vld [vmem:[%s2801_s24 + $0xe8] sm:$0xf0]  ;;  %v1893_v59 = vor.u32 %v2334_v52, %v1890_v53  ;;  %v1856_v60 = vld [vmem:[%s2801_s24 + $0x80] sm:$0xf] }
  0x3f   : > { %850 = vmatpush.bf16.msra.mxu3 %v1965_v39  ;;  %v2330_v61 = vld [vmem:[%s2801_s24 + $0x9c] sm:$0xf0]  ;;  %v1897_v62 = vor.u32 %v2339_v55, %v1896_v54  ;;  %v1901_v63 = vor.u32 %v2335_v56, %v1898_v57  ;;  %v2326_v0 = vld [vmem:[%s2801_s24 + $0x84] sm:$0xf]  ;;  %v1864_v3 = vld [vmem:[%s2801_s24 + $0x88] sm:$0xf] }
  0x40   : > { %v1858_v2 = vld [vmem:[%s2801_s24 + $0xa0] sm:$0xf0]  ;;  %v2331_v4 = vld [vmem:[%s2801_s24 + $0xa4] sm:$0xf0]  ;;  %v2327_v5 = vld [vmem:[%s2801_s24 + $0x8c] sm:$0xf]  ;;  %v1857_v7 = vor.u32 %v2330_v61, %v1856_v60 }
  0x41   : > { %809 = vmatpush.bf16.msra.mxu0 %v1921_v46  ;;  %823 = vmatpush.bf16.msra.mxu1 %v1925_v47  ;;  %v1866_v6 = vld [vmem:[%s2801_s24 + $0xa8] sm:$0xf0]  ;;  %v1861_v8 = vor.u32 %v2326_v0, %v1858_v2  ;;  %v1824_v9 = vld [vmem:[%s2801_s24 + $0x40] sm:$0xf]  ;;  %v1865_v11 = vor.u32 %v2331_v4, %v1864_v3  ;;  %v2318_v13 = vld [vmem:[%s2801_s24 + $0x44] sm:$0xf] }
  0x42   : > { %837 = vmatpush.bf16.msra.mxu2 %v1929_v50  ;;  %v2322_v10 = vld [vmem:[%s2801_s24 + $0x5c] sm:$0xf0]  ;;  %v1869_v12 = vor.u32 %v2327_v5, %v1866_v6  ;;  %v1826_v14 = vld [vmem:[%s2801_s24 + $0x60] sm:$0xf0]  ;;  %v1832_v15 = vld [vmem:[%s2801_s24 + $0x48] sm:$0xf] }
  0x43   : > { %851 = vmatpush.bf16.msra.mxu3 %v1933_v51  ;;  %v2323_v16 = vld [vmem:[%s2801_s24 + $0x64] sm:$0xf0]  ;;  %v2319_v17 = vld [vmem:[%s2801_s24 + $0x4c] sm:$0xf]  ;;  %v1825_v19 = vor.u32 %v2322_v10, %v1824_v9  ;;  %v1792_v20 = vld [vmem:[%s2801_s24] sm:$0xf]  ;;  %v1829_v22 = vor.u32 %v2318_v13, %v1826_v14 }
  0x44   : > { %v1834_v18 = vld [vmem:[%s2801_s24 + $0x68] sm:$0xf0]  ;;  %v2314_v21 = vld [vmem:[%s2801_s24 + $0x1c] sm:$0xf0]  ;;  %v2310_v23 = vld [vmem:[%s2801_s24 + $0x4] sm:$0xf]  ;;  %v1833_v26 = vor.u32 %v2323_v16, %v1832_v15 }
  0x45   : > { %810 = vmatpush.bf16.msra.mxu0 %v1889_v58  ;;  %824 = vmatpush.bf16.msra.mxu1 %v1893_v59  ;;  %v1794_v24 = vld [vmem:[%s2801_s24 + $0x20] sm:$0xf0]  ;;  %v1800_v25 = vld [vmem:[%s2801_s24 + $0x8] sm:$0xf]  ;;  %v1837_v27 = vor.u32 %v2319_v17, %v1834_v18  ;;  %v2032_v29 = vld [vmem:[%s2801_s24 + $0x1d0] sm:$0xf]  ;;  %v1793_v34 = vor.u32 %v2314_v21, %v1792_v20 }
  0x46   : > { %838 = vmatpush.bf16.msra.mxu2 %v1897_v62  ;;  %v2315_v28 = vld [vmem:[%s2801_s24 + $0x24] sm:$0xf0]  ;;  %v2372_v30 = vld [vmem:[%s2801_s24 + $0x1ec] sm:$0xf0]  ;;  %v2311_v31 = vld [vmem:[%s2801_s24 + $0xc] sm:$0xf]  ;;  %v1797_v38 = vor.u32 %v2310_v23, %v1794_v24 }
  0x47   : > { %852 = vmatpush.bf16.msra.mxu3 %v1901_v63  ;;  %v1802_v32 = vld [vmem:[%s2801_s24 + $0x28] sm:$0xf0]  ;;  %v2368_v33 = vld [vmem:[%s2801_s24 + $0x1d4] sm:$0xf]  ;;  %v2040_v36 = vld [vmem:[%s2801_s24 + $0x1d8] sm:$0xf]  ;;  %v2033_v39 = vor.u32 %v2372_v30, %v2032_v29  ;;  %v1801_v42 = vor.u32 %v2315_v28, %v1800_v25 }
  0x48   : > { %v2034_v35 = vld [vmem:[%s2801_s24 + $0x1f0] sm:$0xf0]  ;;  %v2373_v37 = vld [vmem:[%s2801_s24 + $0x1f4] sm:$0xf0]  ;;  %v2369_v40 = vld [vmem:[%s2801_s24 + $0x1dc] sm:$0xf]  ;;  %v1805_v43 = vor.u32 %v2311_v31, %v1802_v32 }
  0x49   : > { %811 = vmatpush.bf16.msra.mxu0 %v1857_v7  ;;  %825 = vmatpush.bf16.msra.mxu1 %v1861_v8  ;;  %v2042_v41 = vld [vmem:[%s2801_s24 + $0x1f8] sm:$0xf0]  ;;  %v2037_v44 = vor.u32 %v2368_v33, %v2034_v35  ;;  %v2041_v45 = vor.u32 %v2373_v37, %v2040_v36  ;;  %v2000_v46 = vld [vmem:[%s2801_s24 + $0x190] sm:$0xf]  ;;  %v2360_v48 = vld [vmem:[%s2801_s24 + $0x194] sm:$0xf] }
  0x4a   : > { %839 = vmatpush.bf16.msra.mxu2 %v1865_v11  ;;  %v2364_v47 = vld [vmem:[%s2801_s24 + $0x1ac] sm:$0xf0]  ;;  %v2045_v49 = vor.u32 %v2369_v40, %v2042_v41  ;;  %v2002_v50 = vld [vmem:[%s2801_s24 + $0x1b0] sm:$0xf0]  ;;  %v2008_v51 = vld [vmem:[%s2801_s24 + $0x198] sm:$0xf] }
  0x4b   : > { %853 = vmatpush.bf16.msra.mxu3 %v1869_v12  ;;  %v2365_v52 = vld [vmem:[%s2801_s24 + $0x1b4] sm:$0xf0]  ;;  %v2907_v53 = vld [vmem:[%s3081_s0] sm:$0xff]  ;;  %v2361_v54 = vld [vmem:[%s2801_s24 + $0x19c] sm:$0xf]  ;;  %v2001_v56 = vor.u32 %v2364_v47, %v2000_v46  ;;  %v2005_v57 = vor.u32 %v2360_v48, %v2002_v50 }
  0x4c   : > { %v2010_v55 = vld [vmem:[%s2801_s24 + $0x1b8] sm:$0xf0]  ;;  %v2009_v58 = vor.u32 %v2365_v52, %v2008_v51  ;;  %v1968_v59 = vld [vmem:[%s2801_s24 + $0x150] sm:$0xf]  ;;  %v2352_v61 = vld [vmem:[%s2801_s24 + $0x154] sm:$0xf] }
  0x4d   : > { %812 = vmatpush.bf16.msra.mxu0 %v1825_v19  ;;  %826 = vmatpush.bf16.msra.mxu1 %v1829_v22  ;;  %v2356_v60 = vld [vmem:[%s2801_s24 + $0x16c] sm:$0xf0]  ;;  %v2013_v62 = vor.u32 %v2361_v54, %v2010_v55  ;;  %v1970_v63 = vld [vmem:[%s2801_s24 + $0x170] sm:$0xf0]  ;;  %v1976_v0 = vld [vmem:[%s2801_s24 + $0x158] sm:$0xf] }
  0x4e   : > { %840 = vmatpush.bf16.msra.mxu2 %v1833_v26  ;;  %v2357_v2 = vld [vmem:[%s2801_s24 + $0x174] sm:$0xf0]  ;;  %v2353_v3 = vld [vmem:[%s2801_s24 + $0x15c] sm:$0xf]  ;;  %v1969_v5 = vor.u32 %v2356_v60, %v1968_v59  ;;  %v1973_v6 = vor.u32 %v2352_v61, %v1970_v63  ;;  %v1936_v8 = vld [vmem:[%s2801_s24 + $0x110] sm:$0xf] }
  0x4f   : > { %854 = vmatpush.bf16.msra.mxu3 %v1837_v27  ;;  %v1978_v4 = vld [vmem:[%s2801_s24 + $0x178] sm:$0xf0]  ;;  %v1977_v7 = vor.u32 %v2357_v2, %v1976_v0  ;;  %v2348_v9 = vld [vmem:[%s2801_s24 + $0x12c] sm:$0xf0]  ;;  %v2344_v10 = vld [vmem:[%s2801_s24 + $0x114] sm:$0xf] }
  0x50   : > { %v1981_v11 = vor.u32 %v2353_v3, %v1978_v4  ;;  %v1938_v12 = vld [vmem:[%s2801_s24 + $0x130] sm:$0xf0]  ;;  %v1944_v13 = vld [vmem:[%s2801_s24 + $0x118] sm:$0xf]  ;;  %v2345_v15 = vld [vmem:[%s2801_s24 + $0x11c] sm:$0xf]  ;;  %v1937_v17 = vor.u32 %v2348_v9, %v1936_v8 }
  0x51   : > { %813 = vmatpush.bf16.msra.mxu0 %v1793_v34  ;;  %827 = vmatpush.bf16.msra.mxu1 %v1797_v38  ;;  %v2349_v14 = vld [vmem:[%s2801_s24 + $0x134] sm:$0xf0]  ;;  %v1946_v16 = vld [vmem:[%s2801_s24 + $0x138] sm:$0xf0]  ;;  %v1941_v18 = vor.u32 %v2344_v10, %v1938_v12  ;;  %v1904_v20 = vld [vmem:[%s2801_s24 + $0xd0] sm:$0xf] }
  0x52   : > { %841 = vmatpush.bf16.msra.mxu2 %v1801_v42  ;;  %v1945_v19 = vor.u32 %v2349_v14, %v1944_v13  ;;  %v2340_v21 = vld [vmem:[%s2801_s24 + $0xec] sm:$0xf0]  ;;  %v2336_v22 = vld [vmem:[%s2801_s24 + $0xd4] sm:$0xf]  ;;  %v1949_v23 = vor.u32 %v2345_v15, %v1946_v16  ;;  %v1912_v25 = vld [vmem:[%s2801_s24 + $0xd8] sm:$0xf] }
  0x53   : > { %855 = vmatpush.bf16.msra.mxu3 %v1805_v43  ;;  %v1906_v24 = vld [vmem:[%s2801_s24 + $0xf0] sm:$0xf0]  ;;  %v2341_v26 = vld [vmem:[%s2801_s24 + $0xf4] sm:$0xf0]  ;;  %v2337_v27 = vld [vmem:[%s2801_s24 + $0xdc] sm:$0xf]  ;;  %v1905_v29 = vor.u32 %v2340_v21, %v1904_v20 }
  0x54   : > { %814 = vmatmul.bf16.vlgmr.msra.gmra.mxu0 %v2907_v53  ;;  %828 = vmatmul.bf16.vlgmr.msra.gmra.mxu1 %v2907_v53  ;;  %v1914_v28 = vld [vmem:[%s2801_s24 + $0xf8] sm:$0xf0]  ;;  %v1909_v30 = vor.u32 %v2336_v22, %v1906_v24  ;;  %v1913_v31 = vor.u32 %v2341_v26, %v1912_v25  ;;  %v1872_v32 = vld [vmem:[%s2801_s24 + $0x90] sm:$0xf]  ;;  %v2328_v34 = vld [vmem:[%s2801_s24 + $0x94] sm:$0xf] }
  0x55   : > { %862 = vmatpush.bf16.msrb.mxu0 %v2033_v39  ;;  %876 = vmatpush.bf16.msrb.mxu1 %v2037_v44  ;;  %v2332_v33 = vld [vmem:[%s2801_s24 + $0xac] sm:$0xf0]  ;;  %v1917_v35 = vor.u32 %v2337_v27, %v1914_v28  ;;  %v1874_v36 = vld [vmem:[%s2801_s24 + $0xb0] sm:$0xf0]  ;;  %v1880_v37 = vld [vmem:[%s2801_s24 + $0x98] sm:$0xf] }
  0x56   : > { %890 = vmatpush.bf16.msrb.mxu2 %v2041_v45  ;;  %856 = vmatmul.bf16.vlgmr.msra.gmra.mxu3 %v2907_v53  ;;  %v2333_v38 = vld [vmem:[%s2801_s24 + $0xb4] sm:$0xf0]  ;;  %v2329_v39 = vld [vmem:[%s2801_s24 + $0x9c] sm:$0xf]  ;;  %v1873_v41 = vor.u32 %v2332_v33, %v1872_v32  ;;  %v1877_v42 = vor.u32 %v2328_v34, %v1874_v36  ;;  %v1840_v44 = vld [vmem:[%s2801_s24 + $0x50] sm:$0xf] }
  0x57   : > { %904 = vmatpush.bf16.msrb.mxu3 %v2045_v49  ;;  %842 = vmatmul.bf16.vlgmr.msra.gmra.mxu2 %v2907_v53  ;;  %v1882_v40 = vld [vmem:[%s2801_s24 + $0xb8] sm:$0xf0]  ;;  %v1881_v43 = vor.u32 %v2333_v38, %v1880_v37  ;;  %v2324_v45 = vld [vmem:[%s2801_s24 + $0x6c] sm:$0xf0]  ;;  %v2320_v46 = vld [vmem:[%s2801_s24 + $0x54] sm:$0xf] }
  0x58   : > { %v1885_v47 = vor.u32 %v2329_v39, %v1882_v40  ;;  %v1842_v48 = vld [vmem:[%s2801_s24 + $0x70] sm:$0xf0]  ;;  %v1848_v49 = vld [vmem:[%s2801_s24 + $0x58] sm:$0xf]  ;;  %v2321_v51 = vld [vmem:[%s2801_s24 + $0x5c] sm:$0xf]  ;;  %v1841_v54 = vor.u32 %v2324_v45, %v1840_v44 }
  0x59   : > { %863 = vmatpush.bf16.msrb.mxu0 %v2001_v56  ;;  %877 = vmatpush.bf16.msrb.mxu1 %v2005_v57  ;;  %v2325_v50 = vld [vmem:[%s2801_s24 + $0x74] sm:$0xf0]  ;;  %v1850_v52 = vld [vmem:[%s2801_s24 + $0x78] sm:$0xf0]  ;;  %v1845_v55 = vor.u32 %v2320_v46, %v1842_v48  ;;  %v1808_v57 = vld [vmem:[%s2801_s24 + $0x10] sm:$0xf] }
  0x5a   : > { %891 = vmatpush.bf16.msrb.mxu2 %v2009_v58  ;;  %v1849_v56 = vor.u32 %v2325_v50, %v1848_v49  ;;  %v2316_v58 = vld [vmem:[%s2801_s24 + $0x2c] sm:$0xf0]  ;;  %v2312_v59 = vld [vmem:[%s2801_s24 + $0x14] sm:$0xf]  ;;  %v1853_v60 = vor.u32 %v2321_v51, %v1850_v52  ;;  %v2317_v63 = vld [vmem:[%s2801_s24 + $0x34] sm:$0xf0] }
  0x5b   : > { %905 = vmatpush.bf16.msrb.mxu3 %v2013_v62  ;;  %v1810_v61 = vld [vmem:[%s2801_s24 + $0x30] sm:$0xf0]  ;;  %v1816_v62 = vld [vmem:[%s2801_s24 + $0x18] sm:$0xf]  ;;  %v2313_v0 = vld [vmem:[%s2801_s24 + $0x1c] sm:$0xf]  ;;  %v1809_v3 = vor.u32 %v2316_v58, %v1808_v57 }
  0x5c   : > { %v1818_v2 = vld [vmem:[%s2801_s24 + $0x38] sm:$0xf0]  ;;  %v1813_v4 = vor.u32 %v2312_v59, %v1810_v61  ;;  %v2380_v10 = vld [vmem:[%s2807_s14 + $0x30] sm:$0xff]  ;;  %v2379_v14 = vld [vmem:[%s2807_s14 + $0x28] sm:$0xff] }
  0x5d   : > { %864 = vmatpush.bf16.msrb.mxu0 %v1969_v5  ;;  %878 = vmatpush.bf16.msrb.mxu1 %v1973_v6  ;;  %v1817_v5 = vor.u32 %v2317_v63, %v1816_v62  ;;  %v1821_v6 = vor.u32 %v2313_v0, %v1818_v2  ;;  %v2389_v8 = vld [vmem:[%s2807_s14 + $0x78] sm:$0xff]  ;;  %v2388_v12 = vld [vmem:[%s2807_s14 + $0x70] sm:$0xff]  ;;  %v2387_v16 = vld [vmem:[%s2807_s14 + $0x68] sm:$0xff] }
  0x5e   : > { %892 = vmatpush.bf16.msrb.mxu2 %v1977_v7  ;;  %v2381_v7 = vld [vmem:[%s2807_s14 + $0x38] sm:$0xff]  ;;  %v2396_v13 = vld [vmem:[%s2807_s14 + $0xb0] sm:$0xff]  ;;  %v2394_v20 = vld [vmem:[%s2807_s14 + $0xa0] sm:$0xff] }
  0x5f   : > { %906 = vmatpush.bf16.msrb.mxu3 %v1981_v11  ;;  %v2397_v9 = vld [vmem:[%s2807_s14 + $0xb8] sm:$0xff]  ;;  %v2404_v15 = vld [vmem:[%s2807_s14 + $0xf0] sm:$0xff]  ;;  %v2402_v22 = vld [vmem:[%s2807_s14 + $0xe0] sm:$0xff] }
  0x60   : > { %v2405_v11 = vld [vmem:[%s2807_s14 + $0xf8] sm:$0xff]  ;;  %v2376_v24 = vld [vmem:[%s2807_s14 + $0x10] sm:$0xff]  ;;  %v2375_v28 = vld [vmem:[%s2807_s14 + $0x8] sm:$0xff] }
  0x61   : > { %865 = vmatpush.bf16.msrb.mxu0 %v1937_v17  ;;  %879 = vmatpush.bf16.msrb.mxu1 %v1941_v18  ;;  %v2395_v17 = vld [vmem:[%s2807_s14 + $0xa8] sm:$0xff]  ;;  %v2378_v18 = vld [vmem:[%s2807_s14 + $0x20] sm:$0xff]  ;;  %v2377_v21 = vld [vmem:[%s2807_s14 + $0x18] sm:$0xff] }
  0x62   : > { %893 = vmatpush.bf16.msrb.mxu2 %v1945_v19  ;;  %v2386_v19 = vld [vmem:[%s2807_s14 + $0x60] sm:$0xff]  ;;  %v2384_v25 = vld [vmem:[%s2807_s14 + $0x50] sm:$0xff]  ;;  %v2393_v26 = vld [vmem:[%s2807_s14 + $0x98] sm:$0xff] }
  0x63   : > { %907 = vmatpush.bf16.msrb.mxu3 %v1949_v23  ;;  %v2385_v23 = vld [vmem:[%s2807_s14 + $0x58] sm:$0xff]  ;;  %v2374_v32 = vld [vmem:[%s2807_s14] sm:$0xff]  ;;  %v2391_v36 = vld [vmem:[%s2807_s14 + $0x88] sm:$0xff] }
  0x64   : > { %v2401_v27 = vld [vmem:[%s2807_s14 + $0xd8] sm:$0xff]  ;;  %v2382_v33 = vld [vmem:[%s2807_s14 + $0x40] sm:$0xff]  ;;  %v2399_v37 = vld [vmem:[%s2807_s14 + $0xc8] sm:$0xff] }
  0x65   : > { %866 = vmatpush.bf16.msrb.mxu0 %v1905_v29  ;;  %880 = vmatpush.bf16.msrb.mxu1 %v1909_v30  ;;  %v2383_v29 = vld [vmem:[%s2807_s14 + $0x48] sm:$0xff]  ;;  %v2392_v30 = vld [vmem:[%s2807_s14 + $0x90] sm:$0xff]  ;;  %v2413_v34 = vld [vmem:[%s2807_s14 + $0x138] sm:$0xff] }
  0x66   : > { %894 = vmatpush.bf16.msrb.mxu2 %v1913_v31  ;;  %v2400_v31 = vld [vmem:[%s2807_s14 + $0xd0] sm:$0xff]  ;;  %v2390_v40 = vld [vmem:[%s2807_s14 + $0x80] sm:$0xff]  ;;  %v2411_v44 = vld [vmem:[%s2807_s14 + $0x128] sm:$0xff] }
  0x67   : > { %908 = vmatpush.bf16.msrb.mxu3 %v1917_v35  ;;  %v2421_v35 = vld [vmem:[%s2807_s14 + $0x178] sm:$0xff]  ;;  %v2412_v38 = vld [vmem:[%s2807_s14 + $0x130] sm:$0xff]  ;;  %v2419_v45 = vld [vmem:[%s2807_s14 + $0x168] sm:$0xff] }
  0x68   : > { %v2420_v39 = vld [vmem:[%s2807_s14 + $0x170] sm:$0xff]  ;;  %v2410_v48 = vld [vmem:[%s2807_s14 + $0x120] sm:$0xff]  ;;  %v2427_v50 = vld [vmem:[%s2807_s14 + $0x1a8] sm:$0xff] }
  0x69   : > { %867 = vmatpush.bf16.msrb.mxu0 %v1873_v41  ;;  %881 = vmatpush.bf16.msrb.mxu1 %v1877_v42  ;;  %v2398_v41 = vld [vmem:[%s2807_s14 + $0xc0] sm:$0xff]  ;;  %v2429_v42 = vld [vmem:[%s2807_s14 + $0x1b8] sm:$0xff]  ;;  %v2428_v46 = vld [vmem:[%s2807_s14 + $0x1b0] sm:$0xff] }
  0x6a   : > { %895 = vmatpush.bf16.msrb.mxu2 %v1881_v43  ;;  %v2437_v43 = vld [vmem:[%s2807_s14 + $0x1f8] sm:$0xff]  ;;  %v2418_v49 = vld [vmem:[%s2807_s14 + $0x160] sm:$0xff]  ;;  %v2435_v51 = vld [vmem:[%s2807_s14 + $0x1e8] sm:$0xff] }
  0x6b   : > { %909 = vmatpush.bf16.msrb.mxu3 %v1885_v47  ;;  %v2436_v47 = vld [vmem:[%s2807_s14 + $0x1f0] sm:$0xff]  ;;  %v2409_v52 = vld [vmem:[%s2807_s14 + $0x118] sm:$0xff]  ;;  %v2434_v57 = vld [vmem:[%s2807_s14 + $0x1e0] sm:$0xff] }
  0x6c   : > { %v2416_v61 = vld [vmem:[%s2807_s14 + $0x150] sm:$0xff]  ;;  %v2425_v0 = vld [vmem:[%s2807_s14 + $0x198] sm:$0xff] }
  0x6d   : > { %868 = vmatpush.bf16.msrb.mxu0 %v1841_v54  ;;  %882 = vmatpush.bf16.msrb.mxu1 %v1845_v55  ;;  %v2417_v54 = vld [vmem:[%s2807_s14 + $0x158] sm:$0xff]  ;;  %v3020_v55 = vld [vmem:[%s386_s13] sm:$0xff] }
  0x6e   : > { %896 = vmatpush.bf16.msrb.mxu2 %v1849_v56  ;;  %v2426_v56 = vld [vmem:[%s2807_s14 + $0x1a0] sm:$0xff]  ;;  %v464_v59 = vperm.slane %v3020_v55, 0  ;;  %v465_v63 = vperm.slane %v3020_v55, 1  ;;  %v2433_v2 = vld [vmem:[%s2807_s14 + $0x1d8] sm:$0xff] }
  0x6f   : > { %910 = vmatpush.bf16.msrb.mxu3 %v1853_v60  ;;  %v2408_v60 = vld [vmem:[%s2807_s14 + $0x110] sm:$0xff] }
  0x71   : > { %869 = vmatpush.bf16.msrb.mxu0 %v1809_v3  ;;  %883 = vmatpush.bf16.msrb.mxu1 %v1813_v4  ;;  %v2407_v4 = vld [vmem:[%s2807_s14 + $0x108] sm:$0xff] }
  0x72   : > { %897 = vmatpush.bf16.msrb.mxu2 %v1817_v5  ;;  %v2415_v5 = vld [vmem:[%s2807_s14 + $0x148] sm:$0xff] }
  0x73   : > { %911 = vmatpush.bf16.msrb.mxu3 %v1821_v6 }
  0x74   : > { %870 = vmatmul.bf16.vlgmr.msrb.gmra.mxu0 %v2907_v53  ;;  %884 = vmatmul.bf16.vlgmr.msrb.gmra.mxu1 %v2907_v53 }
  0x75   : > { %1456 = vmatpush.bf16.msra.mxu0 %v2381_v7  ;;  %1470 = vmatpush.bf16.msra.mxu1 %v2389_v8 }
  0x76   : > { %898 = vmatmul.bf16.vlgmr.msrb.gmra.mxu2 %v2907_v53  ;;  %912 = vmatmul.bf16.vlgmr.msrb.gmra.mxu3 %v2907_v53  ;;  %v2403_v53 = vld [vmem:[%s2807_s14 + $0xe8] sm:$0xff] }
  0x77   : > { %1484 = vmatpush.bf16.msra.mxu2 %v2397_v9  ;;  %1498 = vmatpush.bf16.msra.mxu3 %v2405_v11  ;;  %v2424_v9 = vld [vmem:[%s2807_s14 + $0x190] sm:$0xff]  ;;  %v466_v11 = vperm.slane %v3020_v55, 2 }
  0x79   : > { %1457 = vmatpush.bf16.msra.mxu0 %v2380_v10  ;;  %1471 = vmatpush.bf16.msra.mxu1 %v2388_v12  ;;  %v2432_v10 = vld [vmem:[%s2807_s14 + $0x1d0] sm:$0xff]  ;;  %v467_v12 = vperm.slane %v3020_v55, 3 }
  0x7b   : > { %1485 = vmatpush.bf16.msra.mxu2 %v2396_v13  ;;  %1499 = vmatpush.bf16.msra.mxu3 %v2404_v15 }
  0x7d   : > { %1458 = vmatpush.bf16.msra.mxu0 %v2379_v14  ;;  %1472 = vmatpush.bf16.msra.mxu1 %v2387_v16  ;;  %v2406_v16 = vld [vmem:[%s2807_s14 + $0x100] sm:$0xff] }
  0x7f   : > { %1486 = vmatpush.bf16.msra.mxu2 %v2395_v17  ;;  %1500 = vmatpush.bf16.msra.mxu3 %v2403_v53  ;;  %v2414_v17 = vld [vmem:[%s2807_s14 + $0x140] sm:$0xff] }
  0x81   : > { %1459 = vmatpush.bf16.msra.mxu0 %v2378_v18  ;;  %1473 = vmatpush.bf16.msra.mxu1 %v2386_v19 }
  0x83   : > { %1487 = vmatpush.bf16.msra.mxu2 %v2394_v20  ;;  %1501 = vmatpush.bf16.msra.mxu3 %v2402_v22  ;;  %v2431_v22 = vld [vmem:[%s2807_s14 + $0x1c8] sm:$0xff] }
  0x85   : > { %1460 = vmatpush.bf16.msra.mxu0 %v2377_v21  ;;  %1474 = vmatpush.bf16.msra.mxu1 %v2385_v23  ;;  %v2423_v21 = vld [vmem:[%s2807_s14 + $0x188] sm:$0xff] }
  0x87   : > { %1488 = vmatpush.bf16.msra.mxu2 %v2393_v26  ;;  %1502 = vmatpush.bf16.msra.mxu3 %v2401_v27 }
  0x89   : > { %1461 = vmatpush.bf16.msra.mxu0 %v2376_v24  ;;  %1475 = vmatpush.bf16.msra.mxu1 %v2384_v25 }
  0x8b   : > { %1489 = vmatpush.bf16.msra.mxu2 %v2392_v30  ;;  %1503 = vmatpush.bf16.msra.mxu3 %v2400_v31  ;;  %v2422_v30 = vld [vmem:[%s2807_s14 + $0x180] sm:$0xff] }
  0x8c   : > { %v2430_v31 = vld [vmem:[%s2807_s14 + $0x1c0] sm:$0xff] }
  0x8d   : > { %1462 = vmatpush.bf16.msra.mxu0 %v2375_v28  ;;  %1476 = vmatpush.bf16.msra.mxu1 %v2383_v29 }
  0x8f   : > { %1490 = vmatpush.bf16.msra.mxu2 %v2391_v36  ;;  %1504 = vmatpush.bf16.msra.mxu3 %v2399_v37 }
  0x91   : > { %1463 = vmatpush.bf16.msra.mxu0 %v2374_v32  ;;  %1477 = vmatpush.bf16.msra.mxu1 %v2382_v33 }
  0x93   : > { %1491 = vmatpush.bf16.msra.mxu2 %v2390_v40  ;;  %1505 = vmatpush.bf16.msra.mxu3 %v2398_v41  ;;  %v468_v41 = vperm.slane %v3020_v55, 4 }
  0x95   : > { %1512 = vmatpush.bf16.msrb.mxu0 %v2413_v34  ;;  %1526 = vmatpush.bf16.msrb.mxu1 %v2421_v35 }
  0x97   : > { %1540 = vmatpush.bf16.msrb.mxu2 %v2429_v42  ;;  %1554 = vmatpush.bf16.msrb.mxu3 %v2437_v43  ;;  %v469_v43 = vperm.slane %v3020_v55, 5 }
  0x99   : > { %1513 = vmatpush.bf16.msrb.mxu0 %v2412_v38  ;;  %1527 = vmatpush.bf16.msrb.mxu1 %v2420_v39 }
  0x9b   : > { %1541 = vmatpush.bf16.msrb.mxu2 %v2428_v46  ;;  %1555 = vmatpush.bf16.msrb.mxu3 %v2436_v47 }
  0x9d   : > { %1514 = vmatpush.bf16.msrb.mxu0 %v2411_v44  ;;  %1528 = vmatpush.bf16.msrb.mxu1 %v2419_v45 }
  0x9f   : > { %1542 = vmatpush.bf16.msrb.mxu2 %v2427_v50  ;;  %1556 = vmatpush.bf16.msrb.mxu3 %v2435_v51 }
  0xa1   : > { %1515 = vmatpush.bf16.msrb.mxu0 %v2410_v48  ;;  %1529 = vmatpush.bf16.msrb.mxu1 %v2418_v49 }
  0xa3   : > { %1543 = vmatpush.bf16.msrb.mxu2 %v2426_v56  ;;  %1557 = vmatpush.bf16.msrb.mxu3 %v2434_v57  ;;  %v471_v57 = vperm.slane %v3020_v55, 7 }
  0xa5   : > { %1516 = vmatpush.bf16.msrb.mxu0 %v2409_v52  ;;  %1530 = vmatpush.bf16.msrb.mxu1 %v2417_v54  ;;  %v470_v54 = vperm.slane %v3020_v55, 6 }
  0xa7   : > { %1544 = vmatpush.bf16.msrb.mxu2 %v2425_v0  ;;  %1558 = vmatpush.bf16.msrb.mxu3 %v2433_v2 }
  0xa9   : > { %1517 = vmatpush.bf16.msrb.mxu0 %v2408_v60  ;;  %1531 = vmatpush.bf16.msrb.mxu1 %v2416_v61 }
  0xab   : > { %1545 = vmatpush.bf16.msrb.mxu2 %v2424_v9  ;;  %1559 = vmatpush.bf16.msrb.mxu3 %v2432_v10 }
  0xad   : > { %1518 = vmatpush.bf16.msrb.mxu0 %v2407_v4  ;;  %1532 = vmatpush.bf16.msrb.mxu1 %v2415_v5 }
  0xaf   : > { %1546 = vmatpush.bf16.msrb.mxu2 %v2423_v21  ;;  %1560 = vmatpush.bf16.msrb.mxu3 %v2431_v22 }
  0xb1   : > { %1519 = vmatpush.bf16.msrb.mxu0 %v2406_v16  ;;  %1533 = vmatpush.bf16.msrb.mxu1 %v2414_v17 }
  0xb3   : > { %1547 = vmatpush.bf16.msrb.mxu2 %v2422_v30  ;;  %1561 = vmatpush.bf16.msrb.mxu3 %v2430_v31  ;;  %v934_v31 = vld [vmem:[#allocation2] sm:$0xff] }
  0xd1   : > { %v815_v58 = vpop.f32.mrf.mxu0  ;;  %v829_v62 = vpop.f32.mrf.mxu1 }
  0xd2   : > { %v816_v3 = vadd.f32 %v815_v58, %v464_v59  ;;  %v830_v6 = vadd.f32 %v829_v62, %v465_v63 }
  0xd4   : > { %v918_v14 = vmax.f32 %v816_v3, 0.0  ;;  %v919_v53 = vmax.f32 %v830_v6, 0.0 }
  0xd9   : > { %v857_v8 = vpop.f32.mrf.mxu3  ;;  %v817_v13 = vpop.f32.mrf.mxu0 }
  0xda   : > { %v843_v7 = vpop.f32.mrf.mxu2  ;;  %v818_v15 = vadd.f32 %v817_v13, %v464_v59  ;;  %v831_v18 = vpop.f32.mrf.mxu1  ;;  %v858_v24 = vadd.f32 %v857_v8, %v467_v12 }
  0xdb   : > { %v832_v20 = vadd.f32 %v831_v18, %v465_v63  ;;  %v844_v23 = vadd.f32 %v843_v7, %v466_v11 }
  0xdc   : > { %v926_v19 = vmax.f32 %v818_v15, 0.0  ;;  %v921_v33 = vmax.f32 %v858_v24, 0.0 }
  0xdd   : > { %v927_v26 = vmax.f32 %v832_v20, 0.0  ;;  %v920_v32 = vmax.f32 %v844_v23, 0.0 }
  0xde   : > { %v936_v25 = vpack.c.bf16 %v926_v19, %v918_v14 }
  0xdf   : > { %v937_v27 = vpack.c.bf16 %v927_v26, %v919_v53 }
  0xe0   : > { %1464 = vmatmul.bf16.vlgmr.msra.gmra.mxu0 %v936_v25 }
  0xe1   : > { %v859_v29 = vpop.f32.mrf.mxu3  ;;  %1478 = vmatmul.bf16.vlgmr.msra.gmra.mxu1 %v937_v27 }
  0xe2   : > { %v845_v28 = vpop.f32.mrf.mxu2  ;;  %v860_v35 = vadd.f32 %v859_v29, %v467_v12 }
  0xe3   : > { %v846_v34 = vadd.f32 %v845_v28, %v466_v11 }
  0xe4   : > { %v929_v37 = vmax.f32 %v860_v35, 0.0 }
  0xe5   : > { %v928_v36 = vmax.f32 %v846_v34, 0.0 }
  0xe6   : > { %v939_v39 = vpack.c.bf16 %v929_v37, %v921_v33 }
  0xe7   : > { %v938_v38 = vpack.c.bf16 %v928_v36, %v920_v32 }
  0xe8   : > { %1506 = vmatmul.bf16.vlgmr.msra.gmra.mxu3 %v939_v39  ;;  %v935_v39 = vld [vmem:[#allocation2 + $0x8] sm:$0xff] }
  0xe9   : > { %1492 = vmatmul.bf16.vlgmr.msra.gmra.mxu2 %v938_v38 }
  0xf1   : > { %v871_v40 = vpop.f32.mrf.mxu0  ;;  %v885_v42 = vpop.f32.mrf.mxu1 }
  0xf2   : > { %v872_v44 = vadd.f32 %v871_v40, %v468_v41  ;;  %v886_v45 = vadd.f32 %v885_v42, %v469_v43 }
  0xf4   : > { %v922_v49 = vmax.f32 %v872_v44, 0.0  ;;  %v923_v52 = vmax.f32 %v886_v45, 0.0 }
  0xf9   : > { %v899_v46 = vpop.f32.mrf.mxu2  ;;  %v913_v47 = vpop.f32.mrf.mxu3 }
  0xfa   : > { %v873_v48 = vpop.f32.mrf.mxu0  ;;  %v887_v51 = vpop.f32.mrf.mxu1  ;;  %v900_v61 = vadd.f32 %v899_v46, %v470_v54  ;;  %v914_v63 = vadd.f32 %v913_v47, %v471_v57 }
  0xfb   : > { %v874_v50 = vadd.f32 %v873_v48, %v468_v41  ;;  %v888_v56 = vadd.f32 %v887_v51, %v469_v43 }
  0xfc   : > { %v924_v5 = vmax.f32 %v900_v61, 0.0  ;;  %v925_v7 = vmax.f32 %v914_v63, 0.0 }
  0xfd   : > { %v930_v58 = vmax.f32 %v874_v50, 0.0  ;;  %v931_v59 = vmax.f32 %v888_v56, 0.0 }
  0xff   : > { %v940_v60 = vpack.c.bf16 %v930_v58, %v922_v49  ;;  %v941_v62 = vpack.c.bf16 %v931_v59, %v923_v52 }
 0x101   : > { %v901_v0 = vpop.f32.mrf.mxu2  ;;  %1520 = vmatmul.bf16.vlgmr.msrb.gmra.mxu0 %v940_v60  ;;  %v915_v3 = vpop.f32.mrf.mxu3  ;;  %1534 = vmatmul.bf16.vlgmr.msrb.gmra.mxu1 %v941_v62 }
 0x102   : > { %v902_v2 = vadd.f32 %v901_v0, %v470_v54  ;;  %v916_v4 = vadd.f32 %v915_v3, %v471_v57 }
 0x104   : > { %v932_v6 = vmax.f32 %v902_v2, 0.0  ;;  %v933_v8 = vmax.f32 %v916_v4, 0.0 }
 0x106   : > { %v942_v9 = vpack.c.bf16 %v932_v6, %v924_v5  ;;  %v943_v10 = vpack.c.bf16 %v933_v8, %v925_v7 }
 0x108   : > { %1548 = vmatmul.bf16.vlgmr.msrb.gmra.mxu2 %v942_v9  ;;  %1562 = vmatmul.bf16.vlgmr.msrb.gmra.mxu3 %v943_v10 }
 0x15d   : > { %v1465_v55 = vpop.f32.mrf.mxu0 }
 0x15e   : > { %v1479_v11 = vpop.f32.mrf.mxu1 }
 0x15f   : > { %v1480_v15 = vadd.f32 %v1479_v11, %v1465_v55 }
 0x165   : > { %v1467_v13 = vpop.f32.mrf.mxu0 }
 0x166   : > { %v1481_v16 = vpop.f32.mrf.mxu1 }
 0x167   : > { %v1482_v21 = vadd.f32 %v1481_v16, %v1467_v13 }
 0x16b   : > { %v1507_v14 = vpop.f32.mrf.mxu3 }
 0x16c   : > { %v1493_v12 = vpop.f32.mrf.mxu2 }
 0x16d   : > { %v1494_v17 = vadd.f32 %v1493_v12, %v1480_v15 }
 0x16f   : > { %v1508_v19 = vadd.f32 %v1507_v14, %v1494_v17 }
 0x173   : > { %v1509_v20 = vpop.f32.mrf.mxu3 }
 0x174   : > { %v1495_v53 = vpop.f32.mrf.mxu2 }
 0x175   : > { %v1496_v24 = vadd.f32 %v1495_v53, %v1482_v21 }
 0x177   : > { %v1510_v28 = vadd.f32 %v1509_v20, %v1496_v24 }
 0x17e   : > { %v1521_v18 = vpop.f32.mrf.mxu0  ;;  %v1535_v23 = vpop.f32.mrf.mxu1 }
 0x17f   : > { %v1522_v22 = vadd.f32 %v1521_v18, %v1508_v19 }
 0x181   : > { %v1536_v25 = vadd.f32 %v1535_v23, %v1522_v22 }
 0x186   : > { %v1523_v26 = vpop.f32.mrf.mxu0  ;;  %v1537_v35 = vpop.f32.mrf.mxu1 }
 0x187   : > { %v1524_v32 = vadd.f32 %v1523_v26, %v1510_v28 }
 0x189   : > { %v1538_v36 = vadd.f32 %v1537_v35, %v1524_v32 }
 0x18b   : > { %v1549_v27 = vpop.f32.mrf.mxu2  ;;  %v1563_v30 = vpop.f32.mrf.mxu3 }
 0x18c   : > { %v1550_v29 = vadd.f32 %v1549_v27, %v1536_v25 }
 0x18e   : > { %v1564_v33 = vadd.f32 %v1563_v30, %v1550_v29 }
 0x190   : > { %v1568_v34 = vadd.f32 %v1564_v33, %v934_v31 }
 0x192   : > { %1570 = vst [vmem:[#allocation2] sm:$0xff] %v1568_v34 }
 0x193   : > { %v1551_v37 = vpop.f32.mrf.mxu2  ;;  %v1565_v40 = vpop.f32.mrf.mxu3 }
 0x194   : > { %v1552_v38 = vadd.f32 %v1551_v37, %v1538_v36 }
 0x196   : > { %v1566_v41 = vadd.f32 %v1565_v40, %v1552_v38  ;;  %1575 = sbr.rel (%p2302_p1) target bundleno = 692 (0x2b4), region = 64 }
 0x198   : > { %v1569_v42 = vadd.f32 %v1566_v41, %v935_v39 }
 0x19a   : > { %1571 = vst [vmem:[#allocation2 + $0x8] sm:$0xff] %v1569_v42 }
 0x19b   : > { %v1576_v43 = vld [vmem:[#allocation2] sm:$0xff]  ;;  %v1584_v45 = vunpack.c.l.bf16 %v2824_v1  ;;  %v1585_v50 = vunpack.c.h.bf16 %v2824_v1  ;;  %v2677_v52 = vmov 128.0  }
 0x19c   : > { %v2514_v44 = vld [vmem:[%s3085_s4] ss:$0 sm:$0xff]  ;;  %2517 = vrcp.f32 %v2677_v52 }
 0x19d   : > { %v1582_v46 = vadd.f32 %v2514_v44, %v1576_v43  ;;  %v2515_v18 = vld [vmem:[%s3086_s5] ss:$0 sm:$0xff] }
 0x19e   : > { %v2516_v20 = vld [vmem:[%s3087_s6] ss:$0 sm:$0xff] }
 0x19f   : > { %v1586_v48 = vadd.f32 %v1584_v45, %v1582_v46 }
 0x1a1   : > { %v1577_v47 = vld [vmem:[#allocation2 + $0x8] sm:$0xff]  ;;  %1588 = vadd.xlane.f32.xlu0 %v1586_v48 }
 0x1a2   : > { %v1583_v49 = vadd.f32 %v2514_v44, %v1577_v47  ;;  %v2518_v54 = vpop.eup %2517 }
 0x1a3   : > { %v1593_v56 = vmul.f32 128.0, %v2518_v54  ;;  %vm1597_vm0 = vweird.f32 %v2518_v54 }
 0x1a4   : > { %v1587_v51 = vadd.f32 %v1585_v50, %v1583_v49 }
 0x1a5   : > { %v1594_v57 = vsub.f32 1.0, %v1593_v56 }
 0x1a7   : > { %v1595_v58 = vmul.f32 %v2518_v54, %v1594_v57 }
 0x1a9   : > { %1590 = vadd.xlane.f32.xlu0 %v1587_v51  ;;  %v1596_v59 = vadd.f32 %v2518_v54, %v1595_v58 }
 0x1ab   : > { %v1598_v60 = vsel %vm1597_vm0, %v2518_v54, %v1596_v59 }
 0x214   : > { %v1589_v61 = vpop.xlane.xlu0 %1588 }
 0x215   : > { %v1599_v62 = vmul.f32 %v1598_v60, %v1589_v61 }
 0x217   : > { %v1601_v63 = vsub.f32 %v1586_v48, %v1599_v62 }
 0x219   : > { %v1603_v0 = vmul.f32 %v1601_v63, %v1601_v63 }
 0x21b   : > { %1605 = vadd.xlane.f32.xlu1 %v1603_v0 }
 0x21c   : > { %v1591_v2 = vpop.xlane.xlu0 %1590 }
 0x21d   : > { %v1600_v3 = vmul.f32 %v1598_v60, %v1591_v2 }
 0x21f   : > { %v1602_v4 = vsub.f32 %v1587_v51, %v1600_v3 }
 0x221   : > { %v1604_v1 = vmul.f32 %v1602_v4, %v1602_v4 }
 0x223   : > { %1607 = vadd.xlane.f32.xlu1 %v1604_v1 }
 0x28e   : > { %v1606_v5 = vpop.xlane.xlu1 %1605 }
 0x28f   : > { %v1609_v6 = vmul.f32 %v1606_v5, %v1598_v60 }
 0x291   : > { %v1611_v7 = vadd.f32 1e-05, %v1609_v6 }
 0x293   : > { %2519 = vrsqrt.f32 %v1611_v7  ;;  %vm1619_vm2 = vweird.f32 %v1611_v7 }
 0x296   : > { %v1608_v8 = vpop.xlane.xlu1 %1607 }
 0x297   : > { %v1610_v9 = vmul.f32 %v1608_v8, %v1598_v60 }
 0x299   : > { %v2520_v10 = vpop.eup %2519  ;;  %v1612_v55 = vadd.f32 1e-05, %v1610_v9 }
 0x29a   : > { %v1614_v11 = vmul.f32 %v2520_v10, %v1611_v7  ;;  %vm1620_vm1 = vweird.f32 %v2520_v10 }
 0x29b   : > { %2521 = vrsqrt.f32 %v1612_v55  ;;  %vm1621_vm3 = vmor %vm1619_vm2, %vm1620_vm1  ;;  %vm1629_vm5 = vweird.f32 %v1612_v55 }
 0x29c   : > { %v1615_v12 = vmul.f32 %v2520_v10, %v1614_v11 }
 0x29e   : > { %v1616_v13 = vmul.f32 0.5, %v1615_v12 }
 0x2a0   : > { %v1617_v14 = vsub.f32 1.5, %v1616_v13 }
 0x2a1   : > { %v2522_v15 = vpop.eup %2521 }
 0x2a2   : > { %v1618_v16 = vmul.f32 %v2520_v10, %v1617_v14  ;;  %v1624_v17 = vmul.f32 %v2522_v15, %v1612_v55  ;;  %vm1630_vm4 = vweird.f32 %v2522_v15 }
 0x2a3   : > { %vm1631_vm6 = vmor %vm1629_vm5, %vm1630_vm4 }
 0x2a4   : > { %v1622_v53 = vsel %vm1621_vm3, %v2520_v10, %v1618_v16  ;;  %v1625_v19 = vmul.f32 %v2522_v15, %v1624_v17 }
 0x2a5   : > { %v1633_v21 = vmul.f32 %v1622_v53, %v1601_v63 }
 0x2a6   : > { %v1626_v22 = vmul.f32 0.5, %v1625_v19 }
 0x2a7   : > { %v1639_v23 = vmul.f32 %v2515_v18, %v1633_v21 }
 0x2a8   : > { %v1627_v24 = vsub.f32 1.5, %v1626_v22 }
 0x2a9   : > { %v1645_v25 = vadd.f32 %v2516_v20, %v1639_v23 }
 0x2aa   : > { %v1628_v26 = vmul.f32 %v2522_v15, %v1627_v24 }
 0x2ab   : > { %1647 = vst [vmem:[#allocation8] sm:$0xff] %v1645_v25 }
 0x2ac   : > { %v1632_v27 = vsel %vm1631_vm6, %v2522_v15, %v1628_v26 }
 0x2ad   : > { %v1634_v28 = vmul.f32 %v1632_v27, %v1602_v4 }
 0x2af   : > { %v1640_v29 = vmul.f32 %v2515_v18, %v1634_v28 }
 0x2b1   : > { %v1646_v30 = vadd.f32 %v2516_v20, %v1640_v29 }
 0x2b3   : > { %1648 = vst [vmem:[#allocation8 + $0x8] sm:$0xff] %v1646_v30 }
 0x2b4 PF: > { %s3100_s20 = sadd.s32 4294967295, %s2669_s29   ;;  %s1659_s16 = sshll.u32 %s3088_s7, 4  ;;  %s1660_s16 = int_to_ptr.hbm [resolvable:$true] %s1659_s16 }
 0x2b5   : > { %p2454_p2 = scmp.eq.s32.totalorder %s3100_s20, 1  ;;  %s2678_s14 = smov [#allocation8]  }
 0x2b6   : > { %s1657_s1 = sshll.u32 %s2678_s14, 4  ;;  %s2679_s26 = smov 128   ;;  %s1658_s1 = int_to_ptr.vmem [resolvable:$true] %s1657_s1 }
 0x2b7   : > { %s2680_s8 = smov 8  }
 0x2b8   : > { %2443 = dma.vmem_to_hbm [thread:$0]  (%p2454_p2), %s1658_s1, 256, %s1660_s16, [#allocation5], %s2679_s26, %s2679_s26, %s2680_s8  }
 0x2b9   : > { %2644 = dma.done.wait (%p2454_p2), [#allocation5], 256  }
 0x2ba   : > { %2646 = vsyncadd (%p2454_p2), [#allocation5], 4294967040 }
 0x2bb PF: > { %s24_s29 = sadd.s32 1, %s2669_s29   ;;  %s3101_s13 = sld [smem:[#allocation12_spill]] }
 0x2bc   : > { %p21_p3 = scmp.ge.s32.totalorder %s24_s29, 4   ;;  %s3102_s26 = sld [smem:[#allocation14_spill]] }
 0x2bd   : > { %s3103_s23 = sld [smem:[#allocation13_spill]]  ;;  %s3104_s24 = smov %s2653_s25 }
 0x2be   : > { %s3106_s27 = smov %s2665_s28 }
 0x2bf   :  { %23 = sbr.rel (!%p21_p3) target bundleno = 9 (0x9), region = 113 }
 0x2c1   : > { %s3105_s25 = smov %s3101_s13 }
 0x2c3   : > { %s3107_s28 = smov %s3103_s23 }
 0x2c4   :  { %1676 = vsyncpa [#allocation4], 1 }
 0x2c5   :  { %1678 = vsyncpa [#allocation4 + $0x1], 1 }
 0x2c6   :  { %1679 = vsyncpa [#allocation7], 1 }
 0x2c7   :  { %1681 = vsyncpa [#allocation7 + $0x1], 1 }
 0x2c8   :  { %1682 = vsyncpa [#allocation5], 1 }
 0x2c9   :  { %1684 = vsyncpa [#allocation5 + $0x1], 1 }

</bundles_post_ra>
